<compile_context>
chip_gen: v6e
topology: v6e:2x2x1
jax: 0.10.0
libtpu: 0.0.40
codegen_flags: <defaults>
</compile_context>

<pallas_src>
import math

import jax
import jax.numpy as jnp
from jax import lax
from jax.experimental import pallas as pl
from jax.experimental.pallas import tpu as pltpu


# --------------------------------------------------------------------------------------
# Pallas kernel: one (batch, time-tile) grid step processes ALL layers of the stack.
# --------------------------------------------------------------------------------------
def _dilated_stack_kernel(x_ref, wfg0_ref, wfg1_ref, bfg_ref, wr_ref, br_ref,
                          ws_ref, bs_ref, skips_ref, out_ref, prev_ref):
    depth, C, Tt = prev_ref.shape
    cdt = wfg0_ref.dtype                     # MXU compute dtype (bf16 or f32)
    max_d = 1 << (depth - 1)

    # Zero the carried causal state at the first time-tile of each batch element.
    @pl.when(pl.program_id(1) == 0)
    def _():
        prev_ref[...] = jnp.zeros(prev_ref.shape, prev_ref.dtype)

    x = x_ref[0].astype(jnp.float32)         # (C, Tt) residual stream, carried in f32
    lane_idx = lax.broadcasted_iota(jnp.int32, (C, Tt), 1)   # hoisted: same for all layers

    # TODO(synk): for very deep / wide production stacks convert this static unroll to a
    # lax.fori_loop(..., unroll=True) over stacked weights to bound vreg live ranges.
    for l in range(depth):                   # depth is small & static -> fully unrolled
        d = 1 << l
        x_cdt = x.astype(cdt)
        prev = prev_ref[l]                   # (C, Tt): previous tile of layer-l input (cdt)

        # Carry current tile for the next grid step: only the last max_d columns are read.
        if max_d < Tt:
            prev_ref[l, :, Tt - max_d:] = x_cdt[:, Tt - max_d:]
        else:
            prev_ref[l] = x_cdt

        # Causal shift x[:, t - d] with cross-tile history: one select + one lane roll (XLU).
        #   mixed[:, t] = prev[:, t] for t >= Tt - d else x[:, t];  roll right by d.
        if d == Tt:
            x_prev = prev
        else:
            mixed = jnp.where(lane_idx >= Tt - d, prev, x_cdt)
            x_prev = pltpu.roll(mixed, shift=d, axis=1)          # (C, Tt) = x[:, t - d]

        # Filter + gate for both conv taps: two accumulating (2C, C) @ (C, Tt) MXU matmuls
        # (MXU is far from saturated at these K; avoids a sublane concat store/reload).
        fg = (jnp.dot(wfg0_ref[l], x_prev, preferred_element_type=jnp.float32)
              + jnp.dot(wfg1_ref[l], x_cdt, preferred_element_type=jnp.float32)
              + bfg_ref[l])                                       # (2C, Tt) f32

        # sigmoid(g) == 0.5 * tanh(0.5 * g) + 0.5  -> 2 EUP tanh pushes instead of tanh+exp+rcp.
        gated = jnp.tanh(fg[:C]) * (0.5 * jnp.tanh(0.5 * fg[C:]) + 0.5)   # f32 VPU/EUP math

        # 1x1 residual conv, then 1x1 skip conv applied to the RESIDUAL-conv output
        # (matches the PyTorch module: skip = skipconv1_1(resconv1_1(gated))).
        r = jnp.dot(wr_ref[l], gated.astype(cdt),
                    preferred_element_type=jnp.float32) + br_ref[l]       # (C, Tt)
        skip = jnp.dot(ws_ref[l], r.astype(cdt),
                       preferred_element_type=jnp.float32) + bs_ref[l]    # (S, Tt)

        skips_ref[l, 0] = skip.astype(skips_ref.dtype)   # lane-dense store on time
        x = r + x                                        # residual carry to next layer (f32)

    out_ref[0] = x.astype(out_ref.dtype)                 # final residual stream, (C, Tt)


# --------------------------------------------------------------------------------------
# Wrapper: weight re-layout + tiled pallas_call.  No activation transposes (NCT in/out).
# --------------------------------------------------------------------------------------
def _padded_vmem_bytes(shape, dtype):
    """Approximate VMEM footprint of one buffer after (sublane, lane) tile padding."""
    s = list(shape)
    if len(s) >= 1:
        s[-1] = -(-s[-1] // 128) * 128
    if len(s) >= 2:
        sub = 16 if jnp.dtype(dtype).itemsize == 2 else 8
        s[-2] = -(-s[-2] // sub) * sub
    return math.prod(s) * jnp.dtype(dtype).itemsize


def dilated_stack_forward(x_nct, params_pt, *, time_tile=512,
                          compute_dtype=jnp.bfloat16, out_dtype=jnp.float32):
    """x_nct: (B, C, T) PyTorch layout. Returns (skips (depth, B, S, T), out (B, C, T))."""
    B, C, T = x_nct.shape
    depth = len(params_pt)
    S = params_pt[0]['ws'].shape[0]
    max_d = 1 << (depth - 1)
    f32 = jnp.float32

    time_tile = min(time_tile, T)
    assert T % time_tile == 0, "T must be divisible by time_tile"
    # TODO(synk): carry multi-tile history to support 2**(depth-1) > time_tile.
    assert time_tile >= max_d, "time_tile must cover the largest dilation 2**(depth-1)"
    assert time_tile == T or time_tile % 128 == 0, \
        "time_tile must be a multiple of 128 lanes (or the full sequence)"

    # Weights for left-multiplication in (channels, time) layout.  wfg0/1 are the two conv
    # taps of [filter; gate]:  fg = Wfg0 @ x[t-d] + Wfg1 @ x[t] + bfg.
    wfg0 = jnp.stack([jnp.concatenate([p['wf'][:, :, 0], p['wg'][:, :, 0]], axis=0)
                      for p in params_pt]).astype(compute_dtype)          # (depth, 2C, C)
    wfg1 = jnp.stack([jnp.concatenate([p['wf'][:, :, 1], p['wg'][:, :, 1]], axis=0)
                      for p in params_pt]).astype(compute_dtype)          # (depth, 2C, C)
    bfg = jnp.stack([jnp.concatenate([p['bf'], p['bg']])[:, None]
                     for p in params_pt]).astype(f32)                      # (depth, 2C, 1)
    wr = jnp.stack([p['wr'][:, :, 0] for p in params_pt]).astype(compute_dtype)  # (depth, C, C)
    br = jnp.stack([p['br'][:, None] for p in params_pt]).astype(f32)             # (depth, C, 1)
    ws = jnp.stack([p['ws'][:, :, 0] for p in params_pt]).astype(compute_dtype)  # (depth, S, C)
    bs = jnp.stack([p['bs'][:, None] for p in params_pt]).astype(f32)             # (depth, S, 1)

    # NOTE: on the bf16 path the input itself is quantized to bf16 before HBM (halves the
    # activation read bytes); first-layer inputs therefore carry bf16 quantization error.
    x_in = x_nct.astype(compute_dtype)

    grid = (B, T // time_tile)

    def const_spec(arr):                     # full array, same block every step -> VMEM-resident
        nd = arr.ndim
        return pl.BlockSpec(arr.shape, lambda b, t, _nd=nd: (0,) * _nd)

    in_specs = [
        pl.BlockSpec((1, C, time_tile), lambda b, t: (b, 0, t)),
        const_spec(wfg0), const_spec(wfg1), const_spec(bfg),
        const_spec(wr), const_spec(br), const_spec(ws), const_spec(bs),
    ]
    out_specs = (
        pl.BlockSpec((depth, 1, S, time_tile), lambda b, t: (0, b, 0, t)),
        pl.BlockSpec((1, C, time_tile), lambda b, t: (b, 0, t)),
    )
    out_shape = (jax.ShapeDtypeStruct((depth, B, S, T), out_dtype),
                 jax.ShapeDtypeStruct((B, C, T), out_dtype))

    # Generation-aware VMEM budget derived from the actual block shapes (double-buffered
    # in/out blocks + resident weights + carried causal state), capped at 75% of the chip's
    # per-core VMEM (64 MiB on v7x, 128 MiB on v5e/v6e).
    weights = (wfg0, wfg1, bfg, wr, br, ws, bs)
    vmem_needed = (
        2 * _padded_vmem_bytes((1, C, time_tile), compute_dtype)
        + 2 * sum(_padded_vmem_bytes(w.shape, w.dtype) for w in weights)
        + 2 * _padded_vmem_bytes((depth, 1, S, time_tile), out_dtype)
        + 2 * _padded_vmem_bytes((1, C, time_tile), out_dtype)
        + _padded_vmem_bytes((depth, C, time_tile), compute_dtype)
        + (2 << 20))                          # slack for compiler-internal scratch
    try:
        vmem_cap = int(pltpu.get_tpu_info().vmem_capacity_bytes)
    except Exception:
        vmem_cap = 64 * 1024 * 1024           # conservative: v7x per-core VMEM
    vmem_budget = (vmem_cap * 3) // 4
    assert vmem_needed <= vmem_budget, (
        f"time_tile={time_tile} needs ~{vmem_needed >> 20} MiB VMEM "
        f"> budget {vmem_budget >> 20} MiB; reduce time_tile")
    vmem_limit = min(max(vmem_needed, 32 * 1024 * 1024), vmem_budget)

    flops = 2 * depth * B * T * (5 * C * C + S * C)
    transcendentals = 2 * depth * B * T * C
    bytes_accessed = int(x_in.size) * x_in.dtype.itemsize
    bytes_accessed += sum(int(w.size) * w.dtype.itemsize for w in weights)
    bytes_accessed += (depth * B * S * T + B * C * T) * jnp.dtype(out_dtype).itemsize

    skips, out = pl.pallas_call(
        _dilated_stack_kernel,
        grid=grid,
        in_specs=in_specs,
        out_specs=out_specs,
        out_shape=out_shape,
        scratch_shapes=[pltpu.VMEM((depth, C, time_tile), compute_dtype)],  # causal carry
        compiler_params=pltpu.CompilerParams(
            # batch is "parallel" (fills both TCs on v7x when B >= 2); time must stay the
            # inner "arbitrary" axis because the scratch carry is sequential over tiles.
            dimension_semantics=("parallel", "arbitrary"),
            vmem_limit_bytes=vmem_limit),
        cost_estimate=pl.CostEstimate(flops=flops,
                                      transcendentals=transcendentals,
                                      bytes_accessed=bytes_accessed),
    )(x_in, wfg0, wfg1, bfg, wr, br, ws, bs)
    return skips, out


# --------------------------------------------------------------------------------------
# Deterministic parameter init (mimics PyTorch Conv1d default uniform init).
# --------------------------------------------------------------------------------------
def init_params(key, residual_size, skip_size, dilation_depth):
    params = []
    for _ in range(dilation_depth):
        layer = {}
        for name, shape, fan_in in [
            ('wf', (residual_size, residual_size, 2), residual_size * 2),
            ('bf', (residual_size,), residual_size * 2),
            ('wg', (residual_size, residual_size, 2), residual_size * 2),
            ('bg', (residual_size,), residual_size * 2),
            ('wr', (residual_size, residual_size, 1), residual_size),
            ('br', (residual_size,), residual_size),
            ('ws', (skip_size, residual_size, 1), residual_size),
            ('bs', (skip_size,), residual_size),
        ]:
            key, sub = jax.random.split(key)
            bound = 1.0 / (fan_in ** 0.5)
            layer[name] = jax.random.uniform(sub, shape, jnp.float32, -bound, bound)
        params.append(layer)
    return params


# --------------------------------------------------------------------------------------
# Pure-JAX reference that mirrors the PyTorch module exactly (padded conv + slice).
# --------------------------------------------------------------------------------------
def _causal_conv1d_ref(x_nct, w, b, dilation):
    pad = (w.shape[-1] - 1) * dilation
    y = lax.conv_general_dilated(
        x_nct, w, window_strides=(1,), padding=[(pad, pad)],
        rhs_dilation=(dilation,), dimension_numbers=('NCH', 'OIH', 'NCH'),
        precision=lax.Precision.HIGHEST)
    y = y + b[None, :, None]
    return y[..., :-pad]


def reference_forward(x_nct, params_pt):
    skips = []
    x = x_nct
    for layer_idx, p in enumerate(params_pt):
        d = 2 ** layer_idx
        f = _causal_conv1d_ref(x, p['wf'], p['bf'], d)
        g = _causal_conv1d_ref(x, p['wg'], p['bg'], d)
        fx = jnp.tanh(f) * jax.nn.sigmoid(g)
        fx = lax.conv_general_dilated(
            fx, p['wr'], (1,), [(0, 0)], dimension_numbers=('NCH', 'OIH', 'NCH'),
            precision=lax.Precision.HIGHEST) + p['br'][None, :, None]
        skip = lax.conv_general_dilated(
            fx, p['ws'], (1,), [(0, 0)], dimension_numbers=('NCH', 'OIH', 'NCH'),
            precision=lax.Precision.HIGHEST) + p['bs'][None, :, None]
        skips.append(skip[None])
        x = fx + x
    return jnp.concatenate(skips, axis=0), x


if __name__ == "__main__":
    B, C, S, T, depth = 2, 16, 16, 256, 4       # residual=skip=16 channels, 4 dilations

    key = jax.random.PRNGKey(0)
    key, xkey = jax.random.split(key)
    x = jax.random.normal(xkey, (B, C, T), jnp.float32)       # PyTorch NCT layout
    params = init_params(key, C, S, depth)

    skips_ref_v, out_ref_v = reference_forward(x, params)

    # 1) f32 MXU path: exactness check of the tiled carry / tap-split / roll-shift scheme.
    skips32, out32 = dilated_stack_forward(x, params, compute_dtype=jnp.float32)
    jax.block_until_ready((skips32, out32))
    assert skips32.shape == (depth, B, S, T), skips32.shape
    assert out32.shape == (B, C, T), out32.shape
    assert jnp.allclose(skips32, skips_ref_v, atol=1e-3, rtol=1e-3), "f32 skip mismatch"
    assert jnp.allclose(out32, out_ref_v, atol=1e-3, rtol=1e-3), "f32 residual mismatch"

    # 2) bf16 compute + bf16 outputs (production config): loose tolerance sanity check.
    skips_bf, out_bf = dilated_stack_forward(x, params, compute_dtype=jnp.bfloat16,
                                             out_dtype=jnp.bfloat16)
    jax.block_until_ready((skips_bf, out_bf))
    assert skips_bf.dtype == jnp.bfloat16 and out_bf.dtype == jnp.bfloat16
    assert jnp.allclose(skips_bf.astype(jnp.float32), skips_ref_v,
                        atol=1e-1, rtol=1e-1), "bf16 skip mismatch"
    assert jnp.allclose(out_bf.astype(jnp.float32), out_ref_v,
                        atol=1e-1, rtol=1e-1), "bf16 residual mismatch"

    # 3) Deeper stack, small tile: exercises multiple time tiles, cross-tile carry, and the
    #    dilation == time_tile corner case (d = 128 with time_tile = 128).
    depth2 = 8
    params2 = init_params(jax.random.PRNGKey(1), C, S, depth2)
    skips2, out2 = dilated_stack_forward(x, params2, time_tile=128,
                                         compute_dtype=jnp.float32)
    jax.block_until_ready((skips2, out2))
    skips2_ref, out2_ref = reference_forward(x, params2)
    assert jnp.allclose(skips2, skips2_ref, atol=1e-3, rtol=1e-3), "deep skip mismatch"
    assert jnp.allclose(out2, out2_ref, atol=1e-3, rtol=1e-3), "deep residual mismatch"

    print("KERNEL_OK")
</pallas_src>

<mosaic_0001>
module attributes {stable_mosaic.version = 11 : i64} {
  func.func @_dilated_stack_kernel(%arg0: i32, %arg1: i32, %arg2: memref<1x16x256xf32, #tpu.memory_space<vmem>>, %arg3: memref<4x32x16xf32, #tpu.memory_space<vmem>>, %arg4: memref<4x32x16xf32, #tpu.memory_space<vmem>>, %arg5: memref<4x32x1xf32, #tpu.memory_space<vmem>>, %arg6: memref<4x16x16xf32, #tpu.memory_space<vmem>>, %arg7: memref<4x16x1xf32, #tpu.memory_space<vmem>>, %arg8: memref<4x16x16xf32, #tpu.memory_space<vmem>>, %arg9: memref<4x16x1xf32, #tpu.memory_space<vmem>>, %arg10: memref<4x1x16x256xf32, #tpu.memory_space<vmem>>, %arg11: memref<1x16x256xf32, #tpu.memory_space<vmem>>, %arg12: memref<4x16x256xf32, #tpu.memory_space<vmem>>) attributes {dimension_semantics = [#tpu.dimension_semantics<parallel>, #tpu.dimension_semantics<arbitrary>], iteration_bounds = array<i64: 2, 1>, scalar_prefetch = 0 : i64, scratch_operands = 1 : i64, tpu.core_type = #tpu.core_type<tc>, window_params = [{transform_indices = @transform_0, window_bounds = array<i64: 1, 16, 256>}, {pipeline_mode = #tpu.pipeline_mode<synchronous>, transform_indices = @transform_1, window_bounds = array<i64: 4, 32, 16>}, {pipeline_mode = #tpu.pipeline_mode<synchronous>, transform_indices = @transform_2, window_bounds = array<i64: 4, 32, 16>}, {pipeline_mode = #tpu.pipeline_mode<synchronous>, transform_indices = @transform_3, window_bounds = array<i64: 4, 32, 1>}, {pipeline_mode = #tpu.pipeline_mode<synchronous>, transform_indices = @transform_4, window_bounds = array<i64: 4, 16, 16>}, {pipeline_mode = #tpu.pipeline_mode<synchronous>, transform_indices = @transform_5, window_bounds = array<i64: 4, 16, 1>}, {pipeline_mode = #tpu.pipeline_mode<synchronous>, transform_indices = @transform_6, window_bounds = array<i64: 4, 16, 16>}, {pipeline_mode = #tpu.pipeline_mode<synchronous>, transform_indices = @transform_7, window_bounds = array<i64: 4, 16, 1>}, {transform_indices = @transform_8, window_bounds = array<i64: 4, 1, 16, 256>}, {transform_indices = @transform_9, window_bounds = array<i64: 1, 16, 256>}]} {
    %c0_i32 = arith.constant 0 : i32
    %0 = arith.cmpi eq, %arg1, %c0_i32 : i32
    %1 = arith.extui %0 : i1 to i32
    %c0_i32_0 = arith.constant 0 : i32
    %2 = arith.cmpi ne, %1, %c0_i32_0 : i32
    scf.if %2 {
      %cst_153 = arith.constant 0.000000e+00 : f32
      %209 = vector.broadcast %cst_153 : f32 to vector<4x16x256xf32>
      %c0_154 = arith.constant 0 : index
      %c0_155 = arith.constant 0 : index
      %c0_156 = arith.constant 0 : index
      %210 = vector.load %arg12[%c0_154, %c0_155, %c0_156] : memref<4x16x256xf32, #tpu.memory_space<vmem>>, vector<4x16x256xf32>
      tpu.vector_store %arg12[%c0_154, %c0_155, %c0_156], %209 {strides = array<i32>} : memref<4x16x256xf32, #tpu.memory_space<vmem>>, vector<4x16x256xf32>,
    } else {
    }
    %c0 = arith.constant 0 : index
    %c0_1 = arith.constant 0 : index
    %c0_2 = arith.constant 0 : index
    %3 = vector.load %arg2[%c0, %c0_1, %c0_2] : memref<1x16x256xf32, #tpu.memory_space<vmem>>, vector<1x16x256xf32>
    %4 = vector.shape_cast %3 : vector<1x16x256xf32> to vector<16x256xf32>
    %5 = tpu.iota {dimensions = array<i32: 1>} : vector<16x256xi32>
    %c0_3 = arith.constant 0 : index
    %c0_4 = arith.constant 0 : index
    %c0_5 = arith.constant 0 : index
    %6 = vector.load %arg12[%c0_3, %c0_4, %c0_5] : memref<4x16x256xf32, #tpu.memory_space<vmem>>, vector<1x16x256xf32>
    %7 = vector.shape_cast %6 : vector<1x16x256xf32> to vector<16x256xf32>
    %8 = vector.extract_strided_slice %4 {offsets = [0, 248], sizes = [16, 8], strides = [1, 1]} : vector<16x256xf32> to vector<16x8xf32>
    %c0_6 = arith.constant 0 : index
    %c0_7 = arith.constant 0 : index
    %c248 = arith.constant 248 : index
    %9 = vector.load %arg12[%c0_6, %c0_7, %c248] : memref<4x16x256xf32, #tpu.memory_space<vmem>>, vector<1x16x8xf32>
    %10 = vector.shape_cast %9 : vector<1x16x8xf32> to vector<16x8xf32>
    %11 = vector.shape_cast %8 : vector<16x8xf32> to vector<1x16x8xf32>
    tpu.vector_store %arg12[%c0_6, %c0_7, %c248], %11 {strides = array<i32>} : memref<4x16x256xf32, #tpu.memory_space<vmem>>, vector<1x16x8xf32>,
    %c255_i32 = arith.constant 255 : i32
    %12 = vector.broadcast %c255_i32 : i32 to vector<16x256xi32>
    %13 = arith.cmpi sge, %5, %12 : vector<16x256xi32>
    %14 = arith.select %13, %7, %4 : vector<16x256xi1>, vector<16x256xf32>
    %c1_i32 = arith.constant 1 : i32
    %15 = tpu.dynamic_rotate %14 by %c1_i32 dim 1 : vector<16x256xf32>, i32 -> vector<16x256xf32>
    %c0_8 = arith.constant 0 : index
    %c0_9 = arith.constant 0 : index
    %c0_10 = arith.constant 0 : index
    %16 = vector.load %arg3[%c0_8, %c0_9, %c0_10] : memref<4x32x16xf32, #tpu.memory_space<vmem>>, vector<1x32x16xf32>
    %17 = vector.shape_cast %16 : vector<1x32x16xf32> to vector<32x16xf32>
    %cst = arith.constant dense<0.000000e+00> : vector<32x256xf32>
    %18 = tpu.matmul %17, %15, %cst {dimension_numbers = #tpu.dot_dimension_numbers<[1], [0], [0], [1], [0, 0, 1, 1], [], []>} : vector<32x16xf32>, vector<16x256xf32>, vector<32x256xf32> -> vector<32x256xf32>
    %c0_11 = arith.constant 0 : index
    %c0_12 = arith.constant 0 : index
    %c0_13 = arith.constant 0 : index
    %19 = vector.load %arg4[%c0_11, %c0_12, %c0_13] : memref<4x32x16xf32, #tpu.memory_space<vmem>>, vector<1x32x16xf32>
    %20 = vector.shape_cast %19 : vector<1x32x16xf32> to vector<32x16xf32>
    %cst_14 = arith.constant dense<0.000000e+00> : vector<32x256xf32>
    %21 = tpu.matmul %20, %4, %cst_14 {dimension_numbers = #tpu.dot_dimension_numbers<[1], [0], [0], [1], [0, 0, 1, 1], [], []>} : vector<32x16xf32>, vector<16x256xf32>, vector<32x256xf32> -> vector<32x256xf32>
    %22 = arith.addf %18, %21 : vector<32x256xf32>
    %c0_15 = arith.constant 0 : index
    %c0_16 = arith.constant 0 : index
    %c0_17 = arith.constant 0 : index
    %23 = vector.load %arg5[%c0_15, %c0_16, %c0_17] : memref<4x32x1xf32, #tpu.memory_space<vmem>>, vector<1x32x1xf32>
    %24 = vector.shape_cast %23 : vector<1x32x1xf32> to vector<32x1xf32>
    %25 = vector.broadcast %24 : vector<32x1xf32> to vector<32x256xf32>
    %26 = arith.addf %22, %25 : vector<32x256xf32>
    %27 = vector.extract_strided_slice %26 {offsets = [0, 0], sizes = [16, 256], strides = [1, 1]} : vector<32x256xf32> to vector<16x256xf32>
    %28 = math.tanh %27 : vector<16x256xf32>
    %29 = vector.extract_strided_slice %26 {offsets = [16, 0], sizes = [16, 256], strides = [1, 1]} : vector<32x256xf32> to vector<16x256xf32>
    %cst_18 = arith.constant 5.000000e-01 : f32
    %30 = vector.broadcast %cst_18 : f32 to vector<16x256xf32>
    %31 = arith.mulf %30, %29 : vector<16x256xf32>
    %32 = math.tanh %31 : vector<16x256xf32>
    %cst_19 = arith.constant 5.000000e-01 : f32
    %33 = vector.broadcast %cst_19 : f32 to vector<16x256xf32>
    %34 = arith.mulf %33, %32 : vector<16x256xf32>
    %cst_20 = arith.constant 5.000000e-01 : f32
    %35 = vector.broadcast %cst_20 : f32 to vector<16x256xf32>
    %36 = arith.addf %34, %35 : vector<16x256xf32>
    %37 = arith.mulf %28, %36 : vector<16x256xf32>
    %c0_21 = arith.constant 0 : index
    %c0_22 = arith.constant 0 : index
    %c0_23 = arith.constant 0 : index
    %38 = vector.load %arg6[%c0_21, %c0_22, %c0_23] : memref<4x16x16xf32, #tpu.memory_space<vmem>>, vector<1x16x16xf32>
    %39 = vector.shape_cast %38 : vector<1x16x16xf32> to vector<16x16xf32>
    %cst_24 = arith.constant dense<0.000000e+00> : vector<16x256xf32>
    %40 = tpu.matmul %39, %37, %cst_24 {dimension_numbers = #tpu.dot_dimension_numbers<[1], [0], [0], [1], [0, 0, 1, 1], [], []>} : vector<16x16xf32>, vector<16x256xf32>, vector<16x256xf32> -> vector<16x256xf32>
    %c0_25 = arith.constant 0 : index
    %c0_26 = arith.constant 0 : index
    %c0_27 = arith.constant 0 : index
    %41 = vector.load %arg7[%c0_25, %c0_26, %c0_27] : memref<4x16x1xf32, #tpu.memory_space<vmem>>, vector<1x16x1xf32>
    %42 = vector.shape_cast %41 : vector<1x16x1xf32> to vector<16x1xf32>
    %43 = vector.broadcast %42 : vector<16x1xf32> to vector<16x256xf32>
    %44 = arith.addf %40, %43 : vector<16x256xf32>
    %c0_28 = arith.constant 0 : index
    %c0_29 = arith.constant 0 : index
    %c0_30 = arith.constant 0 : index
    %45 = vector.load %arg8[%c0_28, %c0_29, %c0_30] : memref<4x16x16xf32, #tpu.memory_space<vmem>>, vector<1x16x16xf32>
    %46 = vector.shape_cast %45 : vector<1x16x16xf32> to vector<16x16xf32>
    %cst_31 = arith.constant dense<0.000000e+00> : vector<16x256xf32>
    %47 = tpu.matmul %46, %44, %cst_31 {dimension_numbers = #tpu.dot_dimension_numbers<[1], [0], [0], [1], [0, 0, 1, 1], [], []>} : vector<16x16xf32>, vector<16x256xf32>, vector<16x256xf32> -> vector<16x256xf32>
    %c0_32 = arith.constant 0 : index
    %c0_33 = arith.constant 0 : index
    %c0_34 = arith.constant 0 : index
    %48 = vector.load %arg9[%c0_32, %c0_33, %c0_34] : memref<4x16x1xf32, #tpu.memory_space<vmem>>, vector<1x16x1xf32>
    %49 = vector.shape_cast %48 : vector<1x16x1xf32> to vector<16x1xf32>
    %50 = vector.broadcast %49 : vector<16x1xf32> to vector<16x256xf32>
    %51 = arith.addf %47, %50 : vector<16x256xf32>
    %c0_35 = arith.constant 0 : index
    %c0_36 = arith.constant 0 : index
    %c0_37 = arith.constant 0 : index
    %c0_38 = arith.constant 0 : index
    %52 = vector.load %arg10[%c0_35, %c0_36, %c0_37, %c0_38] : memref<4x1x16x256xf32, #tpu.memory_space<vmem>>, vector<1x1x16x256xf32>
    %53 = vector.shape_cast %52 : vector<1x1x16x256xf32> to vector<16x256xf32>
    %54 = vector.shape_cast %51 : vector<16x256xf32> to vector<1x1x16x256xf32>
    tpu.vector_store %arg10[%c0_35, %c0_36, %c0_37, %c0_38], %54 {strides = array<i32>} : memref<4x1x16x256xf32, #tpu.memory_space<vmem>>, vector<1x1x16x256xf32>,
    %55 = arith.addf %44, %4 : vector<16x256xf32>
    %c1 = arith.constant 1 : index
    %c0_39 = arith.constant 0 : index
    %c0_40 = arith.constant 0 : index
    %56 = vector.load %arg12[%c1, %c0_39, %c0_40] : memref<4x16x256xf32, #tpu.memory_space<vmem>>, vector<1x16x256xf32>
    %57 = vector.shape_cast %56 : vector<1x16x256xf32> to vector<16x256xf32>
    %58 = vector.extract_strided_slice %55 {offsets = [0, 248], sizes = [16, 8], strides = [1, 1]} : vector<16x256xf32> to vector<16x8xf32>
    %c1_41 = arith.constant 1 : index
    %c0_42 = arith.constant 0 : index
    %c248_43 = arith.constant 248 : index
    %59 = vector.load %arg12[%c1_41, %c0_42, %c248_43] : memref<4x16x256xf32, #tpu.memory_space<vmem>>, vector<1x16x8xf32>
    %60 = vector.shape_cast %59 : vector<1x16x8xf32> to vector<16x8xf32>
    %61 = vector.shape_cast %58 : vector<16x8xf32> to vector<1x16x8xf32>
    tpu.vector_store %arg12[%c1_41, %c0_42, %c248_43], %61 {strides = array<i32>} : memref<4x16x256xf32, #tpu.memory_space<vmem>>, vector<1x16x8xf32>,
    %c254_i32 = arith.constant 254 : i32
    %62 = vector.broadcast %c254_i32 : i32 to vector<16x256xi32>
    %63 = arith.cmpi sge, %5, %62 : vector<16x256xi32>
    %64 = arith.select %63, %57, %55 : vector<16x256xi1>, vector<16x256xf32>
    %c2_i32 = arith.constant 2 : i32
    %65 = tpu.dynamic_rotate %64 by %c2_i32 dim 1 : vector<16x256xf32>, i32 -> vector<16x256xf32>
    %c1_44 = arith.constant 1 : index
    %c0_45 = arith.constant 0 : index
    %c0_46 = arith.constant 0 : index
    %66 = vector.load %arg3[%c1_44, %c0_45, %c0_46] : memref<4x32x16xf32, #tpu.memory_space<vmem>>, vector<1x32x16xf32>
    %67 = vector.shape_cast %66 : vector<1x32x16xf32> to vector<32x16xf32>
    %cst_47 = arith.constant dense<0.000000e+00> : vector<32x256xf32>
    %68 = tpu.matmul %67, %65, %cst_47 {dimension_numbers = #tpu.dot_dimension_numbers<[1], [0], [0], [1], [0, 0, 1, 1], [], []>} : vector<32x16xf32>, vector<16x256xf32>, vector<32x256xf32> -> vector<32x256xf32>
    %c1_48 = arith.constant 1 : index
    %c0_49 = arith.constant 0 : index
    %c0_50 = arith.constant 0 : index
    %69 = vector.load %arg4[%c1_48, %c0_49, %c0_50] : memref<4x32x16xf32, #tpu.memory_space<vmem>>, vector<1x32x16xf32>
    %70 = vector.shape_cast %69 : vector<1x32x16xf32> to vector<32x16xf32>
    %cst_51 = arith.constant dense<0.000000e+00> : vector<32x256xf32>
    %71 = tpu.matmul %70, %55, %cst_51 {dimension_numbers = #tpu.dot_dimension_numbers<[1], [0], [0], [1], [0, 0, 1, 1], [], []>} : vector<32x16xf32>, vector<16x256xf32>, vector<32x256xf32> -> vector<32x256xf32>
    %72 = arith.addf %68, %71 : vector<32x256xf32>
    %c1_52 = arith.constant 1 : index
    %c0_53 = arith.constant 0 : index
    %c0_54 = arith.constant 0 : index
    %73 = vector.load %arg5[%c1_52, %c0_53, %c0_54] : memref<4x32x1xf32, #tpu.memory_space<vmem>>, vector<1x32x1xf32>
    %74 = vector.shape_cast %73 : vector<1x32x1xf32> to vector<32x1xf32>
    %75 = vector.broadcast %74 : vector<32x1xf32> to vector<32x256xf32>
    %76 = arith.addf %72, %75 : vector<32x256xf32>
    %77 = vector.extract_strided_slice %76 {offsets = [0, 0], sizes = [16, 256], strides = [1, 1]} : vector<32x256xf32> to vector<16x256xf32>
    %78 = math.tanh %77 : vector<16x256xf32>
    %79 = vector.extract_strided_slice %76 {offsets = [16, 0], sizes = [16, 256], strides = [1, 1]} : vector<32x256xf32> to vector<16x256xf32>
    %cst_55 = arith.constant 5.000000e-01 : f32
    %80 = vector.broadcast %cst_55 : f32 to vector<16x256xf32>
    %81 = arith.mulf %80, %79 : vector<16x256xf32>
    %82 = math.tanh %81 : vector<16x256xf32>
    %cst_56 = arith.constant 5.000000e-01 : f32
    %83 = vector.broadcast %cst_56 : f32 to vector<16x256xf32>
    %84 = arith.mulf %83, %82 : vector<16x256xf32>
    %cst_57 = arith.constant 5.000000e-01 : f32
    %85 = vector.broadcast %cst_57 : f32 to vector<16x256xf32>
    %86 = arith.addf %84, %85 : vector<16x256xf32>
    %87 = arith.mulf %78, %86 : vector<16x256xf32>
    %c1_58 = arith.constant 1 : index
    %c0_59 = arith.constant 0 : index
    %c0_60 = arith.constant 0 : index
    %88 = vector.load %arg6[%c1_58, %c0_59, %c0_60] : memref<4x16x16xf32, #tpu.memory_space<vmem>>, vector<1x16x16xf32>
    %89 = vector.shape_cast %88 : vector<1x16x16xf32> to vector<16x16xf32>
    %cst_61 = arith.constant dense<0.000000e+00> : vector<16x256xf32>
    %90 = tpu.matmul %89, %87, %cst_61 {dimension_numbers = #tpu.dot_dimension_numbers<[1], [0], [0], [1], [0, 0, 1, 1], [], []>} : vector<16x16xf32>, vector<16x256xf32>, vector<16x256xf32> -> vector<16x256xf32>
    %c1_62 = arith.constant 1 : index
    %c0_63 = arith.constant 0 : index
    %c0_64 = arith.constant 0 : index
    %91 = vector.load %arg7[%c1_62, %c0_63, %c0_64] : memref<4x16x1xf32, #tpu.memory_space<vmem>>, vector<1x16x1xf32>
    %92 = vector.shape_cast %91 : vector<1x16x1xf32> to vector<16x1xf32>
    %93 = vector.broadcast %92 : vector<16x1xf32> to vector<16x256xf32>
    %94 = arith.addf %90, %93 : vector<16x256xf32>
    %c1_65 = arith.constant 1 : index
    %c0_66 = arith.constant 0 : index
    %c0_67 = arith.constant 0 : index
    %95 = vector.load %arg8[%c1_65, %c0_66, %c0_67] : memref<4x16x16xf32, #tpu.memory_space<vmem>>, vector<1x16x16xf32>
    %96 = vector.shape_cast %95 : vector<1x16x16xf32> to vector<16x16xf32>
    %cst_68 = arith.constant dense<0.000000e+00> : vector<16x256xf32>
    %97 = tpu.matmul %96, %94, %cst_68 {dimension_numbers = #tpu.dot_dimension_numbers<[1], [0], [0], [1], [0, 0, 1, 1], [], []>} : vector<16x16xf32>, vector<16x256xf32>, vector<16x256xf32> -> vector<16x256xf32>
    %c1_69 = arith.constant 1 : index
    %c0_70 = arith.constant 0 : index
    %c0_71 = arith.constant 0 : index
    %98 = vector.load %arg9[%c1_69, %c0_70, %c0_71] : memref<4x16x1xf32, #tpu.memory_space<vmem>>, vector<1x16x1xf32>
    %99 = vector.shape_cast %98 : vector<1x16x1xf32> to vector<16x1xf32>
    %100 = vector.broadcast %99 : vector<16x1xf32> to vector<16x256xf32>
    %101 = arith.addf %97, %100 : vector<16x256xf32>
    %c1_72 = arith.constant 1 : index
    %c0_73 = arith.constant 0 : index
    %c0_74 = arith.constant 0 : index
    %c0_75 = arith.constant 0 : index
    %102 = vector.load %arg10[%c1_72, %c0_73, %c0_74, %c0_75] : memref<4x1x16x256xf32, #tpu.memory_space<vmem>>, vector<1x1x16x256xf32>
    %103 = vector.shape_cast %102 : vector<1x1x16x256xf32> to vector<16x256xf32>
    %104 = vector.shape_cast %101 : vector<16x256xf32> to vector<1x1x16x256xf32>
    tpu.vector_store %arg10[%c1_72, %c0_73, %c0_74, %c0_75], %104 {strides = array<i32>} : memref<4x1x16x256xf32, #tpu.memory_space<vmem>>, vector<1x1x16x256xf32>,
    %105 = arith.addf %94, %55 : vector<16x256xf32>
    %c2 = arith.constant 2 : index
    %c0_76 = arith.constant 0 : index
    %c0_77 = arith.constant 0 : index
    %106 = vector.load %arg12[%c2, %c0_76, %c0_77] : memref<4x16x256xf32, #tpu.memory_space<vmem>>, vector<1x16x256xf32>
    %107 = vector.shape_cast %106 : vector<1x16x256xf32> to vector<16x256xf32>
    %108 = vector.extract_strided_slice %105 {offsets = [0, 248], sizes = [16, 8], strides = [1, 1]} : vector<16x256xf32> to vector<16x8xf32>
    %c2_78 = arith.constant 2 : index
    %c0_79 = arith.constant 0 : index
    %c248_80 = arith.constant 248 : index
    %109 = vector.load %arg12[%c2_78, %c0_79, %c248_80] : memref<4x16x256xf32, #tpu.memory_space<vmem>>, vector<1x16x8xf32>
    %110 = vector.shape_cast %109 : vector<1x16x8xf32> to vector<16x8xf32>
    %111 = vector.shape_cast %108 : vector<16x8xf32> to vector<1x16x8xf32>
    tpu.vector_store %arg12[%c2_78, %c0_79, %c248_80], %111 {strides = array<i32>} : memref<4x16x256xf32, #tpu.memory_space<vmem>>, vector<1x16x8xf32>,
    %c252_i32 = arith.constant 252 : i32
    %112 = vector.broadcast %c252_i32 : i32 to vector<16x256xi32>
    %113 = arith.cmpi sge, %5, %112 : vector<16x256xi32>
    %114 = arith.select %113, %107, %105 : vector<16x256xi1>, vector<16x256xf32>
    %c4_i32 = arith.constant 4 : i32
    %115 = tpu.dynamic_rotate %114 by %c4_i32 dim 1 : vector<16x256xf32>, i32 -> vector<16x256xf32>
    %c2_81 = arith.constant 2 : index
    %c0_82 = arith.constant 0 : index
    %c0_83 = arith.constant 0 : index
    %116 = vector.load %arg3[%c2_81, %c0_82, %c0_83] : memref<4x32x16xf32, #tpu.memory_space<vmem>>, vector<1x32x16xf32>
    %117 = vector.shape_cast %116 : vector<1x32x16xf32> to vector<32x16xf32>
    %cst_84 = arith.constant dense<0.000000e+00> : vector<32x256xf32>
    %118 = tpu.matmul %117, %115, %cst_84 {dimension_numbers = #tpu.dot_dimension_numbers<[1], [0], [0], [1], [0, 0, 1, 1], [], []>} : vector<32x16xf32>, vector<16x256xf32>, vector<32x256xf32> -> vector<32x256xf32>
    %c2_85 = arith.constant 2 : index
    %c0_86 = arith.constant 0 : index
    %c0_87 = arith.constant 0 : index
    %119 = vector.load %arg4[%c2_85, %c0_86, %c0_87] : memref<4x32x16xf32, #tpu.memory_space<vmem>>, vector<1x32x16xf32>
    %120 = vector.shape_cast %119 : vector<1x32x16xf32> to vector<32x16xf32>
    %cst_88 = arith.constant dense<0.000000e+00> : vector<32x256xf32>
    %121 = tpu.matmul %120, %105, %cst_88 {dimension_numbers = #tpu.dot_dimension_numbers<[1], [0], [0], [1], [0, 0, 1, 1], [], []>} : vector<32x16xf32>, vector<16x256xf32>, vector<32x256xf32> -> vector<32x256xf32>
    %122 = arith.addf %118, %121 : vector<32x256xf32>
    %c2_89 = arith.constant 2 : index
    %c0_90 = arith.constant 0 : index
    %c0_91 = arith.constant 0 : index
    %123 = vector.load %arg5[%c2_89, %c0_90, %c0_91] : memref<4x32x1xf32, #tpu.memory_space<vmem>>, vector<1x32x1xf32>
    %124 = vector.shape_cast %123 : vector<1x32x1xf32> to vector<32x1xf32>
    %125 = vector.broadcast %124 : vector<32x1xf32> to vector<32x256xf32>
    %126 = arith.addf %122, %125 : vector<32x256xf32>
    %127 = vector.extract_strided_slice %126 {offsets = [0, 0], sizes = [16, 256], strides = [1, 1]} : vector<32x256xf32> to vector<16x256xf32>
    %128 = math.tanh %127 : vector<16x256xf32>
    %129 = vector.extract_strided_slice %126 {offsets = [16, 0], sizes = [16, 256], strides = [1, 1]} : vector<32x256xf32> to vector<16x256xf32>
    %cst_92 = arith.constant 5.000000e-01 : f32
    %130 = vector.broadcast %cst_92 : f32 to vector<16x256xf32>
    %131 = arith.mulf %130, %129 : vector<16x256xf32>
    %132 = math.tanh %131 : vector<16x256xf32>
    %cst_93 = arith.constant 5.000000e-01 : f32
    %133 = vector.broadcast %cst_93 : f32 to vector<16x256xf32>
    %134 = arith.mulf %133, %132 : vector<16x256xf32>
    %cst_94 = arith.constant 5.000000e-01 : f32
    %135 = vector.broadcast %cst_94 : f32 to vector<16x256xf32>
    %136 = arith.addf %134, %135 : vector<16x256xf32>
    %137 = arith.mulf %128, %136 : vector<16x256xf32>
    %c2_95 = arith.constant 2 : index
    %c0_96 = arith.constant 0 : index
    %c0_97 = arith.constant 0 : index
    %138 = vector.load %arg6[%c2_95, %c0_96, %c0_97] : memref<4x16x16xf32, #tpu.memory_space<vmem>>, vector<1x16x16xf32>
    %139 = vector.shape_cast %138 : vector<1x16x16xf32> to vector<16x16xf32>
    %cst_98 = arith.constant dense<0.000000e+00> : vector<16x256xf32>
    %140 = tpu.matmul %139, %137, %cst_98 {dimension_numbers = #tpu.dot_dimension_numbers<[1], [0], [0], [1], [0, 0, 1, 1], [], []>} : vector<16x16xf32>, vector<16x256xf32>, vector<16x256xf32> -> vector<16x256xf32>
    %c2_99 = arith.constant 2 : index
    %c0_100 = arith.constant 0 : index
    %c0_101 = arith.constant 0 : index
    %141 = vector.load %arg7[%c2_99, %c0_100, %c0_101] : memref<4x16x1xf32, #tpu.memory_space<vmem>>, vector<1x16x1xf32>
    %142 = vector.shape_cast %141 : vector<1x16x1xf32> to vector<16x1xf32>
    %143 = vector.broadcast %142 : vector<16x1xf32> to vector<16x256xf32>
    %144 = arith.addf %140, %143 : vector<16x256xf32>
    %c2_102 = arith.constant 2 : index
    %c0_103 = arith.constant 0 : index
    %c0_104 = arith.constant 0 : index
    %145 = vector.load %arg8[%c2_102, %c0_103, %c0_104] : memref<4x16x16xf32, #tpu.memory_space<vmem>>, vector<1x16x16xf32>
    %146 = vector.shape_cast %145 : vector<1x16x16xf32> to vector<16x16xf32>
    %cst_105 = arith.constant dense<0.000000e+00> : vector<16x256xf32>
    %147 = tpu.matmul %146, %144, %cst_105 {dimension_numbers = #tpu.dot_dimension_numbers<[1], [0], [0], [1], [0, 0, 1, 1], [], []>} : vector<16x16xf32>, vector<16x256xf32>, vector<16x256xf32> -> vector<16x256xf32>
    %c2_106 = arith.constant 2 : index
    %c0_107 = arith.constant 0 : index
    %c0_108 = arith.constant 0 : index
    %148 = vector.load %arg9[%c2_106, %c0_107, %c0_108] : memref<4x16x1xf32, #tpu.memory_space<vmem>>, vector<1x16x1xf32>
    %149 = vector.shape_cast %148 : vector<1x16x1xf32> to vector<16x1xf32>
    %150 = vector.broadcast %149 : vector<16x1xf32> to vector<16x256xf32>
    %151 = arith.addf %147, %150 : vector<16x256xf32>
    %c2_109 = arith.constant 2 : index
    %c0_110 = arith.constant 0 : index
    %c0_111 = arith.constant 0 : index
    %c0_112 = arith.constant 0 : index
    %152 = vector.load %arg10[%c2_109, %c0_110, %c0_111, %c0_112] : memref<4x1x16x256xf32, #tpu.memory_space<vmem>>, vector<1x1x16x256xf32>
    %153 = vector.shape_cast %152 : vector<1x1x16x256xf32> to vector<16x256xf32>
    %154 = vector.shape_cast %151 : vector<16x256xf32> to vector<1x1x16x256xf32>
    tpu.vector_store %arg10[%c2_109, %c0_110, %c0_111, %c0_112], %154 {strides = array<i32>} : memref<4x1x16x256xf32, #tpu.memory_space<vmem>>, vector<1x1x16x256xf32>,
    %155 = arith.addf %144, %105 : vector<16x256xf32>
    %c3 = arith.constant 3 : index
    %c0_113 = arith.constant 0 : index
    %c0_114 = arith.constant 0 : index
    %156 = vector.load %arg12[%c3, %c0_113, %c0_114] : memref<4x16x256xf32, #tpu.memory_space<vmem>>, vector<1x16x256xf32>
    %157 = vector.shape_cast %156 : vector<1x16x256xf32> to vector<16x256xf32>
    %158 = vector.extract_strided_slice %155 {offsets = [0, 248], sizes = [16, 8], strides = [1, 1]} : vector<16x256xf32> to vector<16x8xf32>
    %c3_115 = arith.constant 3 : index
    %c0_116 = arith.constant 0 : index
    %c248_117 = arith.constant 248 : index
    %159 = vector.load %arg12[%c3_115, %c0_116, %c248_117] : memref<4x16x256xf32, #tpu.memory_space<vmem>>, vector<1x16x8xf32>
    %160 = vector.shape_cast %159 : vector<1x16x8xf32> to vector<16x8xf32>
    %161 = vector.shape_cast %158 : vector<16x8xf32> to vector<1x16x8xf32>
    tpu.vector_store %arg12[%c3_115, %c0_116, %c248_117], %161 {strides = array<i32>} : memref<4x16x256xf32, #tpu.memory_space<vmem>>, vector<1x16x8xf32>,
    %c248_i32 = arith.constant 248 : i32
    %162 = vector.broadcast %c248_i32 : i32 to vector<16x256xi32>
    %163 = arith.cmpi sge, %5, %162 : vector<16x256xi32>
    %164 = arith.select %163, %157, %155 : vector<16x256xi1>, vector<16x256xf32>
    %c8_i32 = arith.constant 8 : i32
    %165 = tpu.dynamic_rotate %164 by %c8_i32 dim 1 : vector<16x256xf32>, i32 -> vector<16x256xf32>
    %c3_118 = arith.constant 3 : index
    %c0_119 = arith.constant 0 : index
    %c0_120 = arith.constant 0 : index
    %166 = vector.load %arg3[%c3_118, %c0_119, %c0_120] : memref<4x32x16xf32, #tpu.memory_space<vmem>>, vector<1x32x16xf32>
    %167 = vector.shape_cast %166 : vector<1x32x16xf32> to vector<32x16xf32>
    %cst_121 = arith.constant dense<0.000000e+00> : vector<32x256xf32>
    %168 = tpu.matmul %167, %165, %cst_121 {dimension_numbers = #tpu.dot_dimension_numbers<[1], [0], [0], [1], [0, 0, 1, 1], [], []>} : vector<32x16xf32>, vector<16x256xf32>, vector<32x256xf32> -> vector<32x256xf32>
    %c3_122 = arith.constant 3 : index
    %c0_123 = arith.constant 0 : index
    %c0_124 = arith.constant 0 : index
    %169 = vector.load %arg4[%c3_122, %c0_123, %c0_124] : memref<4x32x16xf32, #tpu.memory_space<vmem>>, vector<1x32x16xf32>
    %170 = vector.shape_cast %169 : vector<1x32x16xf32> to vector<32x16xf32>
    %cst_125 = arith.constant dense<0.000000e+00> : vector<32x256xf32>
    %171 = tpu.matmul %170, %155, %cst_125 {dimension_numbers = #tpu.dot_dimension_numbers<[1], [0], [0], [1], [0, 0, 1, 1], [], []>} : vector<32x16xf32>, vector<16x256xf32>, vector<32x256xf32> -> vector<32x256xf32>
    %172 = arith.addf %168, %171 : vector<32x256xf32>
    %c3_126 = arith.constant 3 : index
    %c0_127 = arith.constant 0 : index
    %c0_128 = arith.constant 0 : index
    %173 = vector.load %arg5[%c3_126, %c0_127, %c0_128] : memref<4x32x1xf32, #tpu.memory_space<vmem>>, vector<1x32x1xf32>
    %174 = vector.shape_cast %173 : vector<1x32x1xf32> to vector<32x1xf32>
    %175 = vector.broadcast %174 : vector<32x1xf32> to vector<32x256xf32>
    %176 = arith.addf %172, %175 : vector<32x256xf32>
    %177 = vector.extract_strided_slice %176 {offsets = [0, 0], sizes = [16, 256], strides = [1, 1]} : vector<32x256xf32> to vector<16x256xf32>
    %178 = math.tanh %177 : vector<16x256xf32>
    %179 = vector.extract_strided_slice %176 {offsets = [16, 0], sizes = [16, 256], strides = [1, 1]} : vector<32x256xf32> to vector<16x256xf32>
    %cst_129 = arith.constant 5.000000e-01 : f32
    %180 = vector.broadcast %cst_129 : f32 to vector<16x256xf32>
    %181 = arith.mulf %180, %179 : vector<16x256xf32>
    %182 = math.tanh %181 : vector<16x256xf32>
    %cst_130 = arith.constant 5.000000e-01 : f32
    %183 = vector.broadcast %cst_130 : f32 to vector<16x256xf32>
    %184 = arith.mulf %183, %182 : vector<16x256xf32>
    %cst_131 = arith.constant 5.000000e-01 : f32
    %185 = vector.broadcast %cst_131 : f32 to vector<16x256xf32>
    %186 = arith.addf %184, %185 : vector<16x256xf32>
    %187 = arith.mulf %178, %186 : vector<16x256xf32>
    %c3_132 = arith.constant 3 : index
    %c0_133 = arith.constant 0 : index
    %c0_134 = arith.constant 0 : index
    %188 = vector.load %arg6[%c3_132, %c0_133, %c0_134] : memref<4x16x16xf32, #tpu.memory_space<vmem>>, vector<1x16x16xf32>
    %189 = vector.shape_cast %188 : vector<1x16x16xf32> to vector<16x16xf32>
    %cst_135 = arith.constant dense<0.000000e+00> : vector<16x256xf32>
    %190 = tpu.matmul %189, %187, %cst_135 {dimension_numbers = #tpu.dot_dimension_numbers<[1], [0], [0], [1], [0, 0, 1, 1], [], []>} : vector<16x16xf32>, vector<16x256xf32>, vector<16x256xf32> -> vector<16x256xf32>
    %c3_136 = arith.constant 3 : index
    %c0_137 = arith.constant 0 : index
    %c0_138 = arith.constant 0 : index
    %191 = vector.load %arg7[%c3_136, %c0_137, %c0_138] : memref<4x16x1xf32, #tpu.memory_space<vmem>>, vector<1x16x1xf32>
    %192 = vector.shape_cast %191 : vector<1x16x1xf32> to vector<16x1xf32>
    %193 = vector.broadcast %192 : vector<16x1xf32> to vector<16x256xf32>
    %194 = arith.addf %190, %193 : vector<16x256xf32>
    %c3_139 = arith.constant 3 : index
    %c0_140 = arith.constant 0 : index
    %c0_141 = arith.constant 0 : index
    %195 = vector.load %arg8[%c3_139, %c0_140, %c0_141] : memref<4x16x16xf32, #tpu.memory_space<vmem>>, vector<1x16x16xf32>
    %196 = vector.shape_cast %195 : vector<1x16x16xf32> to vector<16x16xf32>
    %cst_142 = arith.constant dense<0.000000e+00> : vector<16x256xf32>
    %197 = tpu.matmul %196, %194, %cst_142 {dimension_numbers = #tpu.dot_dimension_numbers<[1], [0], [0], [1], [0, 0, 1, 1], [], []>} : vector<16x16xf32>, vector<16x256xf32>, vector<16x256xf32> -> vector<16x256xf32>
    %c3_143 = arith.constant 3 : index
    %c0_144 = arith.constant 0 : index
    %c0_145 = arith.constant 0 : index
    %198 = vector.load %arg9[%c3_143, %c0_144, %c0_145] : memref<4x16x1xf32, #tpu.memory_space<vmem>>, vector<1x16x1xf32>
    %199 = vector.shape_cast %198 : vector<1x16x1xf32> to vector<16x1xf32>
    %200 = vector.broadcast %199 : vector<16x1xf32> to vector<16x256xf32>
    %201 = arith.addf %197, %200 : vector<16x256xf32>
    %c3_146 = arith.constant 3 : index
    %c0_147 = arith.constant 0 : index
    %c0_148 = arith.constant 0 : index
    %c0_149 = arith.constant 0 : index
    %202 = vector.load %arg10[%c3_146, %c0_147, %c0_148, %c0_149] : memref<4x1x16x256xf32, #tpu.memory_space<vmem>>, vector<1x1x16x256xf32>
    %203 = vector.shape_cast %202 : vector<1x1x16x256xf32> to vector<16x256xf32>
    %204 = vector.shape_cast %201 : vector<16x256xf32> to vector<1x1x16x256xf32>
    tpu.vector_store %arg10[%c3_146, %c0_147, %c0_148, %c0_149], %204 {strides = array<i32>} : memref<4x1x16x256xf32, #tpu.memory_space<vmem>>, vector<1x1x16x256xf32>,
    %205 = arith.addf %194, %155 : vector<16x256xf32>
    %c0_150 = arith.constant 0 : index
    %c0_151 = arith.constant 0 : index
    %c0_152 = arith.constant 0 : index
    %206 = vector.load %arg11[%c0_150, %c0_151, %c0_152] : memref<1x16x256xf32, #tpu.memory_space<vmem>>, vector<1x16x256xf32>
    %207 = vector.shape_cast %206 : vector<1x16x256xf32> to vector<16x256xf32>
    %208 = vector.shape_cast %205 : vector<16x256xf32> to vector<1x16x256xf32>
    tpu.vector_store %arg11[%c0_150, %c0_151, %c0_152], %208 {strides = array<i32>} : memref<1x16x256xf32, #tpu.memory_space<vmem>>, vector<1x16x256xf32>,
    return
  }
  func.func @transform_0(%arg0: i32, %arg1: i32) -> (i32, i32, i32) {
    %c0_i32 = arith.constant 0 : i32
    %c0_i32_0 = arith.constant 0 : i32
    return %arg0, %c0_i32, %arg1 : i32, i32, i32
  }
  func.func @transform_1(%arg0: i32, %arg1: i32) -> (i32, i32, i32) {
    %c0_i32 = arith.constant 0 : i32
    %c0_i32_0 = arith.constant 0 : i32
    %c0_i32_1 = arith.constant 0 : i32
    %c0_i32_2 = arith.constant 0 : i32
    return %c0_i32, %c0_i32_0, %c0_i32_1 : i32, i32, i32
  }
  func.func @transform_2(%arg0: i32, %arg1: i32) -> (i32, i32, i32) {
    %c0_i32 = arith.constant 0 : i32
    %c0_i32_0 = arith.constant 0 : i32
    %c0_i32_1 = arith.constant 0 : i32
    %c0_i32_2 = arith.constant 0 : i32
    return %c0_i32, %c0_i32_0, %c0_i32_1 : i32, i32, i32
  }
  func.func @transform_3(%arg0: i32, %arg1: i32) -> (i32, i32, i32) {
    %c0_i32 = arith.constant 0 : i32
    %c0_i32_0 = arith.constant 0 : i32
    %c0_i32_1 = arith.constant 0 : i32
    %c0_i32_2 = arith.constant 0 : i32
    return %c0_i32, %c0_i32_0, %c0_i32_1 : i32, i32, i32
  }
  func.func @transform_4(%arg0: i32, %arg1: i32) -> (i32, i32, i32) {
    %c0_i32 = arith.constant 0 : i32
    %c0_i32_0 = arith.constant 0 : i32
    %c0_i32_1 = arith.constant 0 : i32
    %c0_i32_2 = arith.constant 0 : i32
    return %c0_i32, %c0_i32_0, %c0_i32_1 : i32, i32, i32
  }
  func.func @transform_5(%arg0: i32, %arg1: i32) -> (i32, i32, i32) {
    %c0_i32 = arith.constant 0 : i32
    %c0_i32_0 = arith.constant 0 : i32
    %c0_i32_1 = arith.constant 0 : i32
    %c0_i32_2 = arith.constant 0 : i32
    return %c0_i32, %c0_i32_0, %c0_i32_1 : i32, i32, i32
  }
  func.func @transform_6(%arg0: i32, %arg1: i32) -> (i32, i32, i32) {
    %c0_i32 = arith.constant 0 : i32
    %c0_i32_0 = arith.constant 0 : i32
    %c0_i32_1 = arith.constant 0 : i32
    %c0_i32_2 = arith.constant 0 : i32
    return %c0_i32, %c0_i32_0, %c0_i32_1 : i32, i32, i32
  }
  func.func @transform_7(%arg0: i32, %arg1: i32) -> (i32, i32, i32) {
    %c0_i32 = arith.constant 0 : i32
    %c0_i32_0 = arith.constant 0 : i32
    %c0_i32_1 = arith.constant 0 : i32
    %c0_i32_2 = arith.constant 0 : i32
    return %c0_i32, %c0_i32_0, %c0_i32_1 : i32, i32, i32
  }
  func.func @transform_8(%arg0: i32, %arg1: i32) -> (i32, i32, i32, i32) {
    %c0_i32 = arith.constant 0 : i32
    %c0_i32_0 = arith.constant 0 : i32
    %c0_i32_1 = arith.constant 0 : i32
    return %c0_i32, %arg0, %c0_i32_0, %arg1 : i32, i32, i32, i32
  }
  func.func @transform_9(%arg0: i32, %arg1: i32) -> (i32, i32, i32) {
    %c0_i32 = arith.constant 0 : i32
    %c0_i32_0 = arith.constant 0 : i32
    return %arg0, %c0_i32, %arg1 : i32, i32, i32
  }
}

</mosaic_0001>

<bundles_post_ra>
// kernel: tpu_custom_call.1
= control target key start
LH: loop header
LB: loop body
LE: loop exit
PB: predicated region body
PF: predicated region fallthrough
CT: control target
= control target key end

     0   :  { %s3664_s0 = inlined_call_operand.vmem [shape: f32[2,16,256], index: 0, kind: input, shape index: {}]   ;;  %s3665_s1 = inlined_call_operand.vmem [shape: f32[4,32,16], index: 1, kind: input, shape index: {}]   ;;  %s3666_s2 = inlined_call_operand.vmem [shape: f32[4,32,16], index: 2, kind: input, shape index: {}]   ;;  %s3667_s3 = inlined_call_operand.vmem [shape: f32[4,32,1], index: 3, kind: input, shape index: {}]   ;;  %s3668_s4 = inlined_call_operand.vmem [shape: f32[4,16,16], index: 4, kind: input, shape index: {}]   ;;  %s3669_s5 = inlined_call_operand.vmem [shape: f32[4,16,1], index: 5, kind: input, shape index: {}]   ;;  %s3670_s6 = inlined_call_operand.vmem [shape: f32[4,16,16], index: 6, kind: input, shape index: {}]   ;;  %s3671_s7 = inlined_call_operand.vmem [shape: f32[4,16,1], index: 7, kind: input, shape index: {}]   ;;  %s3672_s8 = inlined_call_operand.hbm [shape: f32[4,2,16,256], index: 8, kind: output, shape index: {0}]   ;;  %s3673_s9 = inlined_call_operand.hbm [shape: f32[2,16,256], index: 9, kind: output, shape index: {1}]  }
   0x1   :  { %3674 = sst [smem:[#allocation11_spill]] %s3664_s0 }
   0x2   :  { %3675 = sst [smem:[#allocation12_spill]] %s3665_s1 }
   0x3   :  { %15 = vsyncpa [#allocation4], 0 }
   0x4   :  { %17 = vsyncpa [#allocation4 + $0x1], 0 }
   0x5   :  { %18 = vsyncpa [#allocation6], 0 }
   0x6   :  { %20 = vsyncpa [#allocation6 + $0x1], 0  ;;  %s3020_s30 = smov 0   ;;  %s3022_s10 = smov 0  }
   0x7   :  { %s3024_s11 = smov 0   ;;  %s3026_s12 = smov 0  }
   0x8   :  { %s3028_s13 = smov 0   ;;  %s3030_s14 = smov 0  }
   0x9 LB: > { %s2584_s15 = sadd.s32 4294967295, %s2952_s14   ;;  %s2585_s16 = sadd.s32 4294967294, %s2952_s14   ;;  %s2952_s14 = sphi %s3030_s14, %s26_s14   ;;  %s2948_s13 = sphi %s3028_s13, %s3685_s13   ;;  %s2944_s12 = sphi %s3026_s12, %s3684_s12   ;;  %s2940_s11 = sphi %s3024_s11, %s3683_s11   ;;  %s2936_s10 = sphi %s3022_s10, %s3682_s10   ;;  %s2932_s30 = sphi %s3020_s30, %s3681_s30  }
   0xa   : > { %s38_s17 = sadd.s32 1, %s2948_s13  ;;  %s222_s18 = sadd.s32 1, %s2940_s11 }
   0xb   : > { %p40_p0 = scmp.ge.s32.totalorder %s38_s17, 2  ;;  %p232_p1 = scmp.ne.s32.totalorder %s2940_s11, %s2936_s10 }
   0xc   : > { %p233_p2 = scmp.eq.s32.totalorder %s2584_s15, 1  ;;  %p238_p3 = scmp.ne.s32.totalorder %s2936_s10, %s2932_s30 }
   0xd   : > { %s3687_s17 = smov (%p40_p0, %s38_s17), 0  ;;  %p239_p5 = scmp.eq.s32.totalorder %s2585_s16, 1 }
   0xe   : > { %p3060_p4 = por %p233_p2, %p232_p1  ;;  %s217_s20 = ssub.s32 %s2948_s13, %s3687_s17 }
   0xf   : > { %p2588_p6 = scmp.ge.s32.totalorder %s2952_s14, 1  ;;  %p220_p7 = scmp.eq.s32.totalorder %s217_s20, 0 }
  0x10   : > { %p3067_p8 = por %p239_p5, %p238_p3  ;;  %p319_p9 = scmp.lt.s32.totalorder %s2952_s14, 3 }
  0x11   : > { %s3073_s22 = scalar_select %p220_p7, %s2940_s11, %s222_s18  }
  0x12   : > { %p320_p10 = pnand %p2588_p6, %p319_p9 }
  0x13   : > { %p365_p11 = scmp.lt.s32.totalorder (!%p320_p10), %s2944_s12, 1  ;;  %s3678_s0 = sld [smem:[#allocation11_spill]] (!%p320_p10) }
  0x14   : > { %323 = sbr.rel (%p320_p10) target bundleno = 2520 (0x9d8), region = 52  ;;  %s2955_s28 = smov (!%p320_p10), 1  }
  0x15   : > { %s3679_s1 = sld [smem:[#allocation12_spill]] (!%p320_p10)  ;;  %s3469_s16 = sand.u32 (!%p320_p10), 1, %s2936_s10  }
  0x16   : > { %s2590_s15 = sshll.u32 (!%p320_p10), %s3469_s16, 5  ;;  %s2409_s26 = scalar_lea.sflag (!%p320_p10), [#allocation4], %s3469_s16 }
  0x19   : > { %v400_v0 = vlaneseq  ;;  %v2954_v1 = vmov 0.0   ;;  %s366_s23 = scalar_select %p365_p11, %s2944_s12, 1  ;;  %v433_v10 = vld [vmem:[%s3666_s2] sm:$0xff]  ;;  %vm437_vm1 = vcmask 130048   ;;  %v434_v11 = vld [vmem:[%s3666_s2 + $0x8] sm:$0xff]  ;;  %v643_v12 = vld [vmem:[%s3667_s3 + $0x18] sm:$0xff] }
  0x1a   : > { %380 = vst [vmem:[#allocation2] sm:$0xff] %v2954_v1  ;;  %514 = vmatprep.mubr.f32.mxu0 %v2954_v1  ;;  %615 = vmatprep.mubr.f32.mxu1 %v2954_v1  ;;  %v642_v13 = vld [vmem:[%s3667_s3 + $0x10] sm:$0xff]  ;;  %v2956_v14 = vmov 0   ;;  %v640_v16 = vld [vmem:[%s3667_s3] sm:$0xff]  ;;  %v641_v17 = vld [vmem:[%s3667_s3 + $0x8] sm:$0xff] }
  0x1b   : > { %v3080_v2 = vand.u32 127, %v400_v0  ;;  %s2721_s24 = sshll.u32 %s366_s23, 5  ;;  %2805 = vset.pattern.permute.xlu0 %v2956_v14  ;;  %2806 = vset.pattern.permute.xlu1 %v2956_v14  ;;  %v435_v15 = vld [vmem:[%s3666_s2 + $0x10] sm:$0xff]  ;;  %v436_v18 = vld [vmem:[%s3666_s2 + $0x18] sm:$0xff]  ;;  %v698_v19 = vld [vmem:[%s3669_s5] sm:$0xff]  ;;  %s2589_s23 = sshll.u32 %s3469_s16, 7 }
  0x1c   : > { %s372_s27 = scalar_lea.vmem %s3678_s0, %s2721_s24  ;;  %v699_v20 = vld [vmem:[%s3669_s5 + $0x8] sm:$0xff]  ;;  %v429_v28 = vld [vmem:[%s3679_s1] sm:$0xff]  ;;  %v431_v31 = vld [vmem:[%s3679_s1 + $0x10] sm:$0xff]  ;;  %s3528_s24 = scalar_lea.vmem [#allocation3], %s2589_s23 }
  0x1d   : > { %v3083_v3 = vadd.s32 128, %v3080_v2  ;;  %v3088_v4 = vld [vmem:[%s372_s27 + $0x10] sm:$0xff]  ;;  %v3090_v5 = vld [vmem:[%s372_s27] sm:$0xff]  ;;  %v3092_v6 = vld [vmem:[%s372_s27 + $0x18] sm:$0xff]  ;;  %vm424_vm2 = vcmp.lt.s32.totalorder %v3080_v2, 1  ;;  %vm919_vm4 = vcmp.lt.s32.totalorder %v3080_v2, 2 }
  0x1e   : > { %418 = vrot.lane.b32.xlu0 %v3088_v4, %s2955_s28  ;;  %416 = vrot.lane.b32.xlu1 %v3090_v5, %s2955_s28  ;;  %v3097_v7 = vld [vmem:[%s372_s27 + $0x8] sm:$0xff]  ;;  %v432_v32 = vld [vmem:[%s3679_s1 + $0x18] sm:$0xff]  ;;  %vm1421_vm6 = vcmp.lt.s32.totalorder %v3080_v2, 4  ;;  %vm1923_vm8 = vcmp.lt.s32.totalorder %v3080_v2, 8 }
  0x1f   : > { %vm411_vm0 = vcmp.ge.s32.totalorder %v3083_v3, 255  ;;  %478 = vmatprep.subr.mxu0 %v3092_v6  ;;  %v430_v30 = vld [vmem:[%s3679_s1 + $0x8] sm:$0xff]  ;;  %vm906_vm3 = vcmp.ge.s32.totalorder %v3083_v3, 254  ;;  %vm1408_vm5 = vcmp.ge.s32.totalorder %v3083_v3, 252  ;;  %vm1910_vm7 = vcmp.ge.s32.totalorder %v3083_v3, 248 }
  0x20   : > { %v415_v8 = vsel %vm411_vm0, 0.0, %v3092_v6  ;;  %v413_v9 = vsel %vm411_vm0, 0.0, %v3097_v7  ;;  %479 = vmatpush1.msra.mxu0 %v3088_v4  ;;  %v2682_v3 = vld [vmem:[%s3666_s2 + $0x68] sm:$0xff] }
  0x21   : > { %480 = vmatprep.subr.mxu0 %v3097_v7  ;;  %v2678_v2 = vld [vmem:[%s3679_s1 + $0x68] sm:$0xff] }
  0x22   : > { %422 = vrot.lane.b32.xlu0 %v415_v8, %s2955_s28  ;;  %420 = vrot.lane.b32.xlu1 %v413_v9, %s2955_s28  ;;  %s2957_s28 = smov 2  }
  0x23   : > { %481 = vmatpush1.msra.mxu0 %v3090_v5 }
  0x24   : > { %2593 = vmatmul.mubr.msk.f32.vlgmr.msra.gmra.mxu0 %vm437_vm1, %v433_v10 }
  0x25   : > { %520 = vmatprep.mubr.f32.mxu0 %v2954_v1 }
  0x26   : > { %661 = vperm.xlu0 %2805, %v643_v12   ;;  %656 = vperm.xlu1 %2806, %v642_v13  }
  0x28   : > { %2594 = vmatmul.mubr.msk.f32.gmra.mxu0 %vm437_vm1, %v434_v11 }
  0x29   : > { %526 = vmatprep.mubr.f32.mxu0 %v2954_v1 }
  0x2a   : > { %646 = vperm.xlu0 %2805, %v640_v16   ;;  %651 = vperm.xlu1 %2806, %v641_v17  }
  0x2c   : > { %2595 = vmatmul.mubr.msk.f32.gmra.mxu0 %vm437_vm1, %v435_v15 }
  0x2d   : > { %532 = vmatprep.mubr.f32.mxu0 %v2954_v1 }
  0x2e   : > { %702 = vperm.xlu0 %2805, %v698_v19   ;;  %707 = vperm.xlu1 %2806, %v699_v20  }
  0x30   : > { %2596 = vmatmul.mubr.msk.f32.gmra.mxu0 %vm437_vm1, %v436_v18 }
  0x31   : > { %780 = vmatprep.mubr.f32.mxu0 %v2954_v1 }
  0x90   : > { %v419_v21 = vpop.permute.xlu0 %418  ;;  %v417_v22 = vpop.permute.xlu1 %416 }
  0x94   : > { %v423_v23 = vpop.permute.xlu0 %422  ;;  %v421_v24 = vpop.permute.xlu1 %420 }
  0x95   : > { %v426_v25 = vsel %vm424_vm2, %v419_v21, %v423_v23  ;;  %v428_v26 = vsel %vm424_vm2, %v423_v23, %v419_v21  ;;  %v425_v27 = vsel %vm424_vm2, %v417_v22, %v421_v24  ;;  %v427_v29 = vsel %vm424_vm2, %v421_v24, %v417_v22 }
  0x96   : > { %579 = vmatprep.subr.mxu1 %v426_v25 }
  0x97   : > { %580 = vmatpush1.msra.mxu1 %v428_v26 }
  0x98   : > { %581 = vmatprep.subr.mxu1 %v425_v27 }
  0x99   : > { %582 = vmatpush1.msra.mxu1 %v427_v29 }
  0x9a   : > { %2597 = vmatmul.mubr.msk.f32.vlgmr.msra.gmra.mxu1 %vm437_vm1, %v429_v28 }
  0x9b   : > { %621 = vmatprep.mubr.f32.mxu1 %v2954_v1 }
  0x9e   : > { %2598 = vmatmul.mubr.msk.f32.gmra.mxu1 %vm437_vm1, %v430_v30 }
  0x9f   : > { %627 = vmatprep.mubr.f32.mxu1 %v2954_v1 }
  0xa1   : > { %v657_v44 = vpop.permute.xlu1 %656  ;;  %v662_v51 = vpop.permute.xlu0 %661 }
  0xa2   : > { %2599 = vmatmul.mubr.msk.f32.gmra.mxu1 %vm437_vm1, %v431_v31 }
  0xa3   : > { %633 = vmatprep.mubr.f32.mxu1 %v2954_v1 }
  0xa5   : > { %v652_v8 = vpop.permute.xlu1 %651  ;;  %v647_v11 = vpop.permute.xlu0 %646 }
  0xa6   : > { %2600 = vmatmul.mubr.msk.f32.gmra.mxu1 %vm437_vm1, %v432_v32 }
  0xa7   : > { %877 = vmatprep.mubr.f32.mxu1 %v2954_v1 }
  0xe4   : > { %v516_v33 = vpop.f32.mrf.mxu0 }
  0xe6   : > { %v518_v34 = vpop.f32.mrf.mxu0 }
  0xe8   : > { %v522_v35 = vpop.f32.mrf.mxu0 }
  0xea   : > { %v524_v36 = vpop.f32.mrf.mxu0 }
  0xec   : > { %v528_v39 = vpop.f32.mrf.mxu0 }
  0xee   : > { %v530_v42 = vpop.f32.mrf.mxu0 }
  0xf0   : > { %v534_v46 = vpop.f32.mrf.mxu0 }
  0xf2   : > { %v536_v55 = vpop.f32.mrf.mxu0 }
 0x15a   : > { %v617_v37 = vpop.f32.mrf.mxu1 }
 0x15b   : > { %v618_v10 = vadd.f32 %v617_v37, %v516_v33  ;;  %v697_v37 = vld [vmem:[%s3668_s4 + $0x8] sm:$0xff] }
 0x15c   : > { %v619_v38 = vpop.f32.mrf.mxu1 }
 0x15d   : > { %v620_v0 = vadd.f32 %v619_v38, %v518_v34  ;;  %v664_v15 = vadd.f32 %v647_v11, %v618_v10 }
 0x15e   : > { %v623_v40 = vpop.f32.mrf.mxu1 }
 0x15f   : > { %v624_v63 = vadd.f32 %v623_v40, %v522_v35  ;;  %v665_v14 = vadd.f32 %v647_v11, %v620_v0 }
 0x160   : > { %v625_v41 = vpop.f32.mrf.mxu1 }
 0x161   : > { %v626_v60 = vadd.f32 %v625_v41, %v524_v36  ;;  %v666_v13 = vadd.f32 %v652_v8, %v624_v63  ;;  %v696_v36 = vld [vmem:[%s3668_s4] sm:$0xff] }
 0x162   : > { %v629_v43 = vpop.f32.mrf.mxu1 }
 0x163   : > { %v630_v45 = vadd.f32 %v629_v43, %v528_v39  ;;  %v667_v12 = vadd.f32 %v652_v8, %v626_v60  ;;  %v703_v39 = vpop.permute.xlu0 %702  ;;  %v2627_v60 = vld [vmem:[%s3669_s5 + $0x10] sm:$0xff] }
 0x164   : > { %v631_v47 = vpop.f32.mrf.mxu1 }
 0x165   : > { %v668_v48 = vadd.f32 %v657_v44, %v630_v45  ;;  %v632_v49 = vadd.f32 %v631_v47, %v530_v42  ;;  %v708_v42 = vpop.permute.xlu1 %707 }
 0x166   : > { %v635_v50 = vpop.f32.mrf.mxu1 }
 0x167   : > { %v669_v52 = vadd.f32 %v657_v44, %v632_v49  ;;  %v636_v53 = vadd.f32 %v635_v50, %v534_v46  ;;  %v676_v54 = vmul.f32 0.5, %v668_v48 }
 0x168   : > { %v637_v56 = vpop.f32.mrf.mxu1 }
 0x169   : > { %v677_v57 = vmul.f32 0.5, %v669_v52  ;;  %v670_v58 = vadd.f32 %v662_v51, %v636_v53  ;;  %v638_v59 = vadd.f32 %v637_v56, %v536_v55  ;;  %v794_v53 = vld [vmem:[%s3670_s6 + $0x8] sm:$0xff] }
 0x16a   : > { %v2610_v55 = vld [vmem:[%s3666_s2 + $0x28] sm:$0xff] }
 0x16b   : > { %2807 = vtanh.f32 %v677_v57  ;;  %v678_v61 = vmul.f32 0.5, %v670_v58  ;;  %v671_v62 = vadd.f32 %v662_v51, %v638_v59  ;;  %v2624_v51 = vld [vmem:[%s3667_s3 + $0x38] sm:$0xff]  ;;  %v2622_v56 = vld [vmem:[%s3667_s3 + $0x28] sm:$0xff]  ;;  %v2621_v57 = vld [vmem:[%s3667_s3 + $0x20] sm:$0xff] }
 0x16c   : > { %2809 = vtanh.f32 %v676_v54  ;;  %v2623_v54 = vld [vmem:[%s3667_s3 + $0x30] sm:$0xff]  ;;  %v2628_v59 = vld [vmem:[%s3669_s5 + $0x18] sm:$0xff] }
 0x16d   : > { %2811 = vtanh.f32 %v678_v61  ;;  %v679_v9 = vmul.f32 0.5, %v671_v62  ;;  %v2611_v58 = vld [vmem:[%s3666_s2 + $0x30] sm:$0xff]  ;;  %v2612_v61 = vld [vmem:[%s3666_s2 + $0x38] sm:$0xff] }
 0x16f   : > { %2813 = vtanh.f32 %v679_v9 }
 0x170   : > { %2815 = vtanh.f32 %v667_v12 }
 0x171   : > { %2817 = vtanh.f32 %v666_v13  ;;  %v2605_v13 = vld [vmem:[%s3679_s1 + $0x20] sm:$0xff] }
 0x172   : > { %2819 = vtanh.f32 %v665_v14  ;;  %v2606_v14 = vld [vmem:[%s3679_s1 + $0x28] sm:$0xff] }
 0x173   : > { %2821 = vtanh.f32 %v664_v15  ;;  %v2607_v15 = vld [vmem:[%s3679_s1 + $0x30] sm:$0xff] }
 0x178   : > { %v2808_v16 = vpop.eup %2807 }
 0x179   : > { %v2810_v17 = vpop.eup %2809  ;;  %v685_v20 = vmul.f32 0.5, %v2808_v16  ;;  %v2608_v16 = vld [vmem:[%s3679_s1 + $0x38] sm:$0xff] }
 0x17a   : > { %v2812_v18 = vpop.eup %2811  ;;  %v684_v22 = vmul.f32 0.5, %v2810_v17 }
 0x17b   : > { %v686_v19 = vmul.f32 0.5, %v2812_v18  ;;  %v689_v26 = vadd.f32 0.5, %v685_v20 }
 0x17c   : > { %v2814_v21 = vpop.eup %2813  ;;  %v688_v28 = vadd.f32 0.5, %v684_v22 }
 0x17d   : > { %v687_v23 = vmul.f32 0.5, %v2814_v21  ;;  %v690_v24 = vadd.f32 0.5, %v686_v19  ;;  %v2816_v27 = vpop.eup %2815 }
 0x17e   : > { %v2818_v29 = vpop.eup %2817 }
 0x17f   : > { %v691_v25 = vadd.f32 0.5, %v687_v23  ;;  %v2820_v31 = vpop.eup %2819  ;;  %v694_v32 = vmul.f32 %v2818_v29, %v690_v24 }
 0x180   : > { %v2822_v33 = vpop.eup %2821  ;;  %v693_v34 = vmul.f32 %v2820_v31, %v689_v26 }
 0x181   : > { %v695_v30 = vmul.f32 %v2816_v27, %v691_v25  ;;  %v692_v35 = vmul.f32 %v2822_v33, %v688_v28 }
 0x183   : > { %744 = vmatprep.subr.mxu0 %v695_v30 }
 0x184   : > { %745 = vmatpush1.msra.mxu0 %v694_v32 }
 0x185   : > { %746 = vmatprep.subr.mxu0 %v693_v34 }
 0x186   : > { %747 = vmatpush1.msra.mxu0 %v692_v35 }
 0x187   : > { %2601 = vmatmul.mubr.msk.f32.vlgmr.msra.gmra.mxu0 %vm437_vm1, %v696_v36 }
 0x188   : > { %786 = vmatprep.mubr.f32.mxu0 %v2954_v1 }
 0x18b   : > { %2602 = vmatmul.mubr.msk.f32.gmra.mxu0 %vm437_vm1, %v697_v37 }
 0x18c   : > { %1010 = vmatprep.mubr.f32.mxu0 %v2954_v1 }
 0x247   : > { %v782_v38 = vpop.f32.mrf.mxu0 }
 0x248   : > { %v783_v47 = vadd.f32 %v782_v38, %v703_v39 }
 0x249   : > { %v784_v40 = vpop.f32.mrf.mxu0 }
 0x24a   : > { %v785_v41 = vadd.f32 %v784_v40, %v703_v39 }
 0x24b   : > { %v788_v43 = vpop.f32.mrf.mxu0 }
 0x24c   : > { %v3175_v44 = vadd.f32 %v785_v41, %v3097_v7  ;;  %v789_v45 = vadd.f32 %v788_v43, %v708_v42  ;;  %v3186_v7 = vadd.f32 %v783_v47, %v3090_v5  ;;  %v2609_v5 = vld [vmem:[%s3666_s2 + $0x20] sm:$0xff] }
 0x24d   : > { %v790_v46 = vpop.f32.mrf.mxu0 }
 0x24e   : > { %v3178_v48 = vadd.f32 %v789_v45, %v3088_v4  ;;  %v791_v49 = vadd.f32 %v790_v46, %v708_v42  ;;  %v908_v52 = vsel %vm906_vm3, 0.0, %v3175_v44 }
 0x250   : > { %v3181_v50 = vadd.f32 %v791_v49, %v3092_v6  ;;  %841 = vmatprep.subr.mxu1 %v791_v49  ;;  %913 = vrot.lane.b32.xlu1 %v3178_v48, %s2957_s28  ;;  %v793_v6 = vld [vmem:[%s3670_s6] sm:$0xff] }
 0x251   : > { %842 = vmatpush1.msra.mxu1 %v789_v45 }
 0x252   : > { %843 = vmatprep.subr.mxu1 %v785_v41  ;;  %974 = vmatprep.subr.mxu0 %v3181_v50  ;;  %v910_v4 = vsel %vm906_vm3, 0.0, %v3181_v50 }
 0x253   : > { %917 = vrot.lane.b32.xlu0 %v910_v4, %s2957_s28  ;;  %844 = vmatpush1.msra.mxu1 %v783_v47 }
 0x254   : > { %975 = vmatpush1.msra.mxu0 %v3178_v48  ;;  %911 = vrot.lane.b32.xlu1 %v3186_v7, %s2957_s28 }
 0x255   : > { %976 = vmatprep.subr.mxu0 %v3175_v44  ;;  %2603 = vmatmul.mubr.msk.f32.vlgmr.msra.gmra.mxu1 %vm437_vm1, %v793_v6 }
 0x256   : > { %977 = vmatpush1.msra.mxu0 %v3186_v7  ;;  %883 = vmatprep.mubr.f32.mxu1 %v2954_v1 }
 0x257   : > { %915 = vrot.lane.b32.xlu0 %v908_v52, %s2957_s28  ;;  %2613 = vmatmul.mubr.msk.f32.vlgmr.msra.gmra.mxu0 %vm437_vm1, %v2609_v5  ;;  %s2958_s28 = smov 4  }
 0x258   : > { %1158 = vperm.xlu1 %2806, %v2624_v51   ;;  %1016 = vmatprep.mubr.f32.mxu0 %v2954_v1 }
 0x259   : > { %2604 = vmatmul.mubr.msk.f32.gmra.mxu1 %vm437_vm1, %v794_v53 }
 0x25a   : > { %1111 = vmatprep.mubr.f32.mxu1 %v2954_v1 }
 0x25b   : > { %1153 = vperm.xlu0 %2805, %v2623_v54   ;;  %2614 = vmatmul.mubr.msk.f32.gmra.mxu0 %vm437_vm1, %v2610_v55 }
 0x25c   : > { %1148 = vperm.xlu1 %2806, %v2622_v56   ;;  %1022 = vmatprep.mubr.f32.mxu0 %v2954_v1 }
 0x25f   : > { %1143 = vperm.xlu0 %2805, %v2621_v57   ;;  %2615 = vmatmul.mubr.msk.f32.gmra.mxu0 %vm437_vm1, %v2611_v58 }
 0x260   : > { %1206 = vperm.xlu1 %2806, %v2628_v59   ;;  %1028 = vmatprep.mubr.f32.mxu0 %v2954_v1 }
 0x263   : > { %1201 = vperm.xlu0 %2805, %v2627_v60   ;;  %2616 = vmatmul.mubr.msk.f32.gmra.mxu0 %vm437_vm1, %v2612_v61 }
 0x264   : > { %1279 = vmatprep.mubr.f32.mxu0 %v2954_v1 }
 0x2c2   : > { %v914_v62 = vpop.permute.xlu1 %913 }
 0x2c5   : > { %v918_v63 = vpop.permute.xlu0 %917 }
 0x2c6   : > { %v923_v0 = vsel %vm919_vm4, %v918_v63, %v914_v62  ;;  %v921_v8 = vsel %vm919_vm4, %v914_v62, %v918_v63  ;;  %v912_v9 = vpop.permute.xlu1 %911 }
 0x2c7   : > { %1075 = vmatprep.subr.mxu1 %v921_v8 }
 0x2c8   : > { %1076 = vmatpush1.msra.mxu1 %v923_v0 }
 0x2c9   : > { %v916_v10 = vpop.permute.xlu0 %915 }
 0x2ca   : > { %v922_v11 = vsel %vm919_vm4, %v916_v10, %v912_v9  ;;  %v920_v12 = vsel %vm919_vm4, %v912_v9, %v916_v10 }
 0x2cb   : > { %1077 = vmatprep.subr.mxu1 %v920_v12 }
 0x2cc   : > { %1078 = vmatpush1.msra.mxu1 %v922_v11 }
 0x2cd   : > { %2617 = vmatmul.mubr.msk.f32.vlgmr.msra.gmra.mxu1 %vm437_vm1, %v2605_v13 }
 0x2ce   : > { %1117 = vmatprep.mubr.f32.mxu1 %v2954_v1 }
 0x2d1   : > { %2618 = vmatmul.mubr.msk.f32.gmra.mxu1 %vm437_vm1, %v2606_v14 }
 0x2d2   : > { %1123 = vmatprep.mubr.f32.mxu1 %v2954_v1 }
 0x2d3   : > { %v1159_v39 = vpop.permute.xlu1 %1158 }
 0x2d5   : > { %2619 = vmatmul.mubr.msk.f32.gmra.mxu1 %vm437_vm1, %v2607_v15 }
 0x2d6   : > { %1129 = vmatprep.mubr.f32.mxu1 %v2954_v1  ;;  %v1154_v32 = vpop.permute.xlu0 %1153 }
 0x2d7   : > { %v1149_v54 = vpop.permute.xlu1 %1148 }
 0x2d9   : > { %2620 = vmatmul.mubr.msk.f32.gmra.mxu1 %vm437_vm1, %v2608_v16 }
 0x2da   : > { %1378 = vmatprep.mubr.f32.mxu1 %v2954_v1  ;;  %v1144_v57 = vpop.permute.xlu0 %1143 }
 0x315   : > { %v3264_v17 = vpop.f32.mrf.mxu1 }
 0x317   : > { %v1012_v18 = vpop.f32.mrf.mxu0  ;;  %v3266_v19 = vpop.f32.mrf.mxu1 }
 0x319   : > { %v1014_v20 = vpop.f32.mrf.mxu0  ;;  %v3268_v21 = vpop.f32.mrf.mxu1 }
 0x31b   : > { %v1018_v22 = vpop.f32.mrf.mxu0  ;;  %v3270_v23 = vpop.f32.mrf.mxu1 }
 0x31d   : > { %v1020_v24 = vpop.f32.mrf.mxu0 }
 0x31f   : > { %v1024_v27 = vpop.f32.mrf.mxu0 }
 0x321   : > { %v1026_v30 = vpop.f32.mrf.mxu0 }
 0x323   : > { %v1030_v34 = vpop.f32.mrf.mxu0 }
 0x325   : > { %v1032_v43 = vpop.f32.mrf.mxu0 }
 0x38d   : > { %v1113_v25 = vpop.f32.mrf.mxu1 }
 0x38e   : > { %v1114_v55 = vadd.f32 %v1113_v25, %v1012_v18 }
 0x38f   : > { %v1115_v26 = vpop.f32.mrf.mxu1 }
 0x390   : > { %v1116_v52 = vadd.f32 %v1115_v26, %v1014_v20  ;;  %v1161_v60 = vadd.f32 %v1144_v57, %v1114_v55 }
 0x391   : > { %v1119_v28 = vpop.f32.mrf.mxu1 }
 0x392   : > { %v1120_v51 = vadd.f32 %v1119_v28, %v1018_v22  ;;  %v1162_v59 = vadd.f32 %v1144_v57, %v1116_v52  ;;  %v2625_v28 = vld [vmem:[%s3668_s4 + $0x10] sm:$0xff]  ;;  %v2663_v52 = vld [vmem:[%s3669_s5 + $0x20] sm:$0xff] }
 0x393   : > { %v1121_v29 = vpop.f32.mrf.mxu1 }
 0x394   : > { %v1122_v4 = vadd.f32 %v1121_v29, %v1020_v24  ;;  %v1163_v58 = vadd.f32 %v1149_v54, %v1120_v51  ;;  %v2626_v29 = vld [vmem:[%s3668_s4 + $0x18] sm:$0xff]  ;;  %v2664_v51 = vld [vmem:[%s3669_s5 + $0x28] sm:$0xff] }
 0x395   : > { %v1125_v31 = vpop.f32.mrf.mxu1 }
 0x396   : > { %v1126_v33 = vadd.f32 %v1125_v31, %v1024_v27  ;;  %v1164_v56 = vadd.f32 %v1149_v54, %v1122_v4  ;;  %v1202_v31 = vpop.permute.xlu0 %1201  ;;  %v2658_v4 = vld [vmem:[%s3667_s3 + $0x48] sm:$0xff] }
 0x397   : > { %v1127_v35 = vpop.f32.mrf.mxu1 }
 0x398   : > { %v1165_v36 = vadd.f32 %v1154_v32, %v1126_v33  ;;  %v1128_v37 = vadd.f32 %v1127_v35, %v1026_v30 }
 0x399   : > { %v1131_v38 = vpop.f32.mrf.mxu1 }
 0x39a   : > { %v1166_v40 = vadd.f32 %v1154_v32, %v1128_v37  ;;  %v1132_v41 = vadd.f32 %v1131_v38, %v1030_v34  ;;  %v1173_v42 = vmul.f32 0.5, %v1165_v36  ;;  %v1207_v34 = vpop.permute.xlu1 %1206 }
 0x39b   : > { %v1133_v45 = vpop.f32.mrf.mxu1 }
 0x39c   : > { %v1174_v46 = vmul.f32 0.5, %v1166_v40  ;;  %v1167_v47 = vadd.f32 %v1159_v39, %v1132_v41  ;;  %v1134_v49 = vadd.f32 %v1133_v45, %v1032_v43  ;;  %v2660_v43 = vld [vmem:[%s3667_s3 + $0x58] sm:$0xff] }
 0x39e   : > { %2823 = vtanh.f32 %v1174_v46  ;;  %v1175_v6 = vmul.f32 0.5, %v1167_v47  ;;  %v1168_v5 = vadd.f32 %v1159_v39, %v1134_v49  ;;  %v2632_v46 = vld [vmem:[%s3670_s6 + $0x18] sm:$0xff]  ;;  %v2659_v47 = vld [vmem:[%s3667_s3 + $0x50] sm:$0xff]  ;;  %v2646_v49 = vld [vmem:[%s3666_s2 + $0x48] sm:$0xff] }
 0x39f   : > { %2825 = vtanh.f32 %v1173_v42 }
 0x3a0   : > { %2827 = vtanh.f32 %v1175_v6  ;;  %v1176_v53 = vmul.f32 0.5, %v1168_v5  ;;  %v2657_v6 = vld [vmem:[%s3667_s3 + $0x40] sm:$0xff]  ;;  %v2647_v5 = vld [vmem:[%s3666_s2 + $0x50] sm:$0xff] }
 0x3a2   : > { %2829 = vtanh.f32 %v1176_v53  ;;  %v2648_v53 = vld [vmem:[%s3666_s2 + $0x58] sm:$0xff] }
 0x3a3   : > { %2831 = vtanh.f32 %v1164_v56 }
 0x3a4   : > { %2833 = vtanh.f32 %v1163_v58 }
 0x3a5   : > { %2835 = vtanh.f32 %v1162_v59 }
 0x3a6   : > { %2837 = vtanh.f32 %v1161_v60 }
 0x3ab   : > { %v2824_v61 = vpop.eup %2823 }
 0x3ac   : > { %v2826_v62 = vpop.eup %2825  ;;  %v1182_v8 = vmul.f32 0.5, %v2824_v61 }
 0x3ad   : > { %v2828_v63 = vpop.eup %2827  ;;  %v1181_v10 = vmul.f32 0.5, %v2826_v62  ;;  %v2641_v62 = vld [vmem:[%s3679_s1 + $0x40] sm:$0xff] }
 0x3ae   : > { %v1183_v0 = vmul.f32 0.5, %v2828_v63  ;;  %v1186_v14 = vadd.f32 0.5, %v1182_v8  ;;  %v2642_v63 = vld [vmem:[%s3679_s1 + $0x48] sm:$0xff]  ;;  %v2644_v8 = vld [vmem:[%s3679_s1 + $0x58] sm:$0xff] }
 0x3af   : > { %v2830_v9 = vpop.eup %2829  ;;  %v1185_v16 = vadd.f32 0.5, %v1181_v10 }
 0x3b0   : > { %v1184_v11 = vmul.f32 0.5, %v2830_v9  ;;  %v1187_v12 = vadd.f32 0.5, %v1183_v0  ;;  %v2832_v15 = vpop.eup %2831  ;;  %v2643_v0 = vld [vmem:[%s3679_s1 + $0x50] sm:$0xff] }
 0x3b1   : > { %v2834_v18 = vpop.eup %2833 }
 0x3b2   : > { %v1188_v13 = vadd.f32 0.5, %v1184_v11  ;;  %v2836_v22 = vpop.eup %2835  ;;  %v1191_v24 = vmul.f32 %v2834_v18, %v1187_v12 }
 0x3b3   : > { %v2838_v25 = vpop.eup %2837  ;;  %v1190_v26 = vmul.f32 %v2836_v22, %v1186_v14 }
 0x3b4   : > { %v1192_v20 = vmul.f32 %v2832_v15, %v1188_v13  ;;  %v1189_v27 = vmul.f32 %v2838_v25, %v1185_v16 }
 0x3b6   : > { %1243 = vmatprep.subr.mxu0 %v1192_v20 }
 0x3b7   : > { %1244 = vmatpush1.msra.mxu0 %v1191_v24 }
 0x3b8   : > { %1245 = vmatprep.subr.mxu0 %v1190_v26 }
 0x3b9   : > { %1246 = vmatpush1.msra.mxu0 %v1189_v27 }
 0x3ba   : > { %2629 = vmatmul.mubr.msk.f32.vlgmr.msra.gmra.mxu0 %vm437_vm1, %v2625_v28 }
 0x3bb   : > { %1285 = vmatprep.mubr.f32.mxu0 %v2954_v1 }
 0x3be   : > { %2630 = vmatmul.mubr.msk.f32.gmra.mxu0 %vm437_vm1, %v2626_v29 }
 0x3bf   : > { %1512 = vmatprep.mubr.f32.mxu0 %v2954_v1 }
 0x47a   : > { %v1281_v30 = vpop.f32.mrf.mxu0 }
 0x47b   : > { %v1282_v39 = vadd.f32 %v1281_v30, %v1202_v31 }
 0x47c   : > { %v1283_v32 = vpop.f32.mrf.mxu0 }
 0x47d   : > { %v1284_v33 = vadd.f32 %v1283_v32, %v1202_v31 }
 0x47e   : > { %v1287_v35 = vpop.f32.mrf.mxu0 }
 0x47f   : > { %v3283_v36 = vadd.f32 %v1284_v33, %v3175_v44  ;;  %v1288_v37 = vadd.f32 %v1287_v35, %v1207_v34  ;;  %v3294_v44 = vadd.f32 %v1282_v39, %v3186_v7  ;;  %v2645_v7 = vld [vmem:[%s3666_s2 + $0x40] sm:$0xff] }
 0x480   : > { %v1289_v38 = vpop.f32.mrf.mxu0 }
 0x481   : > { %v3286_v40 = vadd.f32 %v1288_v37, %v3178_v48  ;;  %v1290_v41 = vadd.f32 %v1289_v38, %v1207_v34  ;;  %v1410_v45 = vsel %vm1408_vm5, 0.0, %v3283_v36 }
 0x483   : > { %v3289_v42 = vadd.f32 %v1290_v41, %v3181_v50  ;;  %1342 = vmatprep.subr.mxu1 %v1290_v41  ;;  %1415 = vrot.lane.b32.xlu1 %v3286_v40, %s2958_s28  ;;  %v2631_v50 = vld [vmem:[%s3670_s6 + $0x10] sm:$0xff] }
 0x484   : > { %1343 = vmatpush1.msra.mxu1 %v1288_v37 }
 0x485   : > { %1344 = vmatprep.subr.mxu1 %v1284_v33  ;;  %1476 = vmatprep.subr.mxu0 %v3289_v42  ;;  %v1412_v48 = vsel %vm1408_vm5, 0.0, %v3289_v42 }
 0x486   : > { %1419 = vrot.lane.b32.xlu0 %v1412_v48, %s2958_s28  ;;  %1345 = vmatpush1.msra.mxu1 %v1282_v39 }
 0x487   : > { %1477 = vmatpush1.msra.mxu0 %v3286_v40  ;;  %1413 = vrot.lane.b32.xlu1 %v3294_v44, %s2958_s28 }
 0x488   : > { %1478 = vmatprep.subr.mxu0 %v3283_v36  ;;  %2635 = vmatmul.mubr.msk.f32.vlgmr.msra.gmra.mxu1 %vm437_vm1, %v2631_v50 }
 0x489   : > { %1479 = vmatpush1.msra.mxu0 %v3294_v44  ;;  %1384 = vmatprep.mubr.f32.mxu1 %v2954_v1 }
 0x48a   : > { %1417 = vrot.lane.b32.xlu0 %v1410_v45, %s2958_s28  ;;  %2649 = vmatmul.mubr.msk.f32.vlgmr.msra.gmra.mxu0 %vm437_vm1, %v2645_v7  ;;  %s2959_s28 = smov 8  }
 0x48b   : > { %1660 = vperm.xlu1 %2806, %v2660_v43   ;;  %1518 = vmatprep.mubr.f32.mxu0 %v2954_v1 }
 0x48c   : > { %2636 = vmatmul.mubr.msk.f32.gmra.mxu1 %vm437_vm1, %v2632_v46 }
 0x48d   : > { %1613 = vmatprep.mubr.f32.mxu1 %v2954_v1 }
 0x48e   : > { %1655 = vperm.xlu0 %2805, %v2659_v47   ;;  %2650 = vmatmul.mubr.msk.f32.gmra.mxu0 %vm437_vm1, %v2646_v49 }
 0x48f   : > { %1650 = vperm.xlu1 %2806, %v2658_v4   ;;  %1524 = vmatprep.mubr.f32.mxu0 %v2954_v1 }
 0x492   : > { %1645 = vperm.xlu0 %2805, %v2657_v6   ;;  %2651 = vmatmul.mubr.msk.f32.gmra.mxu0 %vm437_vm1, %v2647_v5 }
 0x493   : > { %1708 = vperm.xlu1 %2806, %v2664_v51   ;;  %1530 = vmatprep.mubr.f32.mxu0 %v2954_v1 }
 0x496   : > { %1703 = vperm.xlu0 %2805, %v2663_v52   ;;  %2652 = vmatmul.mubr.msk.f32.gmra.mxu0 %vm437_vm1, %v2648_v53 }
 0x497   : > { %1781 = vmatprep.mubr.f32.mxu0 %v2954_v1 }
 0x4f5   : > { %v1416_v54 = vpop.permute.xlu1 %1415 }
 0x4f8   : > { %v1420_v55 = vpop.permute.xlu0 %1419 }
 0x4f9   : > { %v1425_v56 = vsel %vm1421_vm6, %v1420_v55, %v1416_v54  ;;  %v1423_v57 = vsel %vm1421_vm6, %v1416_v54, %v1420_v55  ;;  %v1414_v58 = vpop.permute.xlu1 %1413 }
 0x4fa   : > { %1577 = vmatprep.subr.mxu1 %v1423_v57 }
 0x4fb   : > { %1578 = vmatpush1.msra.mxu1 %v1425_v56 }
 0x4fc   : > { %v1418_v59 = vpop.permute.xlu0 %1417 }
 0x4fd   : > { %v1424_v60 = vsel %vm1421_vm6, %v1418_v59, %v1414_v58  ;;  %v1422_v61 = vsel %vm1421_vm6, %v1414_v58, %v1418_v59 }
 0x4fe   : > { %1579 = vmatprep.subr.mxu1 %v1422_v61 }
 0x4ff   : > { %1580 = vmatpush1.msra.mxu1 %v1424_v60 }
 0x500   : > { %2653 = vmatmul.mubr.msk.f32.vlgmr.msra.gmra.mxu1 %vm437_vm1, %v2641_v62 }
 0x501   : > { %1619 = vmatprep.mubr.f32.mxu1 %v2954_v1 }
 0x504   : > { %2654 = vmatmul.mubr.msk.f32.gmra.mxu1 %vm437_vm1, %v2642_v63 }
 0x505   : > { %1625 = vmatprep.mubr.f32.mxu1 %v2954_v1 }
 0x506   : > { %v1661_v35 = vpop.permute.xlu1 %1660 }
 0x508   : > { %2655 = vmatmul.mubr.msk.f32.gmra.mxu1 %vm437_vm1, %v2643_v0 }
 0x509   : > { %1631 = vmatprep.mubr.f32.mxu1 %v2954_v1  ;;  %v1656_v28 = vpop.permute.xlu0 %1655 }
 0x50a   : > { %v1651_v5 = vpop.permute.xlu1 %1650 }
 0x50c   : > { %2656 = vmatmul.mubr.msk.f32.gmra.mxu1 %vm437_vm1, %v2644_v8 }
 0x50d   : > { %1880 = vmatprep.mubr.f32.mxu1 %v2954_v1  ;;  %v1646_v53 = vpop.permute.xlu0 %1645 }
 0x548   : > { %v3372_v9 = vpop.f32.mrf.mxu1 }
 0x54a   : > { %v1514_v10 = vpop.f32.mrf.mxu0  ;;  %v3374_v11 = vpop.f32.mrf.mxu1 }
 0x54c   : > { %v1516_v12 = vpop.f32.mrf.mxu0  ;;  %v3376_v13 = vpop.f32.mrf.mxu1 }
 0x54e   : > { %v1520_v14 = vpop.f32.mrf.mxu0  ;;  %v3378_v15 = vpop.f32.mrf.mxu1 }
 0x550   : > { %v1522_v16 = vpop.f32.mrf.mxu0 }
 0x552   : > { %v1526_v22 = vpop.f32.mrf.mxu0 }
 0x554   : > { %v1528_v26 = vpop.f32.mrf.mxu0 }
 0x556   : > { %v1532_v30 = vpop.f32.mrf.mxu0 }
 0x558   : > { %v1534_v41 = vpop.f32.mrf.mxu0 }
 0x5c0   : > { %v1615_v18 = vpop.f32.mrf.mxu1 }
 0x5c1   : > { %v1616_v51 = vadd.f32 %v1615_v18, %v1514_v10 }
 0x5c2   : > { %v1617_v20 = vpop.f32.mrf.mxu1 }
 0x5c3   : > { %v1618_v4 = vadd.f32 %v1617_v20, %v1516_v12  ;;  %v1663_v56 = vadd.f32 %v1646_v53, %v1616_v51  ;;  %v2699_v51 = vld [vmem:[%s3669_s5 + $0x30] sm:$0xff] }
 0x5c4   : > { %v1621_v24 = vpop.f32.mrf.mxu1 }
 0x5c5   : > { %v1622_v49 = vadd.f32 %v1621_v24, %v1520_v14  ;;  %v1664_v55 = vadd.f32 %v1646_v53, %v1618_v4  ;;  %v2693_v4 = vld [vmem:[%s3667_s3 + $0x60] sm:$0xff] }
 0x5c6   : > { %v1623_v25 = vpop.f32.mrf.mxu1  ;;  %v795_v53 = vld [vmem:[%s3671_s7] sm:$0xff] }
 0x5c7   : > { %v1624_v45 = vadd.f32 %v1623_v25, %v1522_v16  ;;  %v1665_v54 = vadd.f32 %v1651_v5, %v1622_v49  ;;  %v2694_v49 = vld [vmem:[%s3667_s3 + $0x68] sm:$0xff] }
 0x5c8   : > { %v1627_v27 = vpop.f32.mrf.mxu1 }
 0x5c9   : > { %v1628_v29 = vadd.f32 %v1627_v27, %v1526_v22  ;;  %v1666_v52 = vadd.f32 %v1651_v5, %v1624_v45  ;;  %v2700_v5 = vld [vmem:[%s3669_s5 + $0x38] sm:$0xff] }
 0x5ca   : > { %v1629_v31 = vpop.f32.mrf.mxu1 }
 0x5cb   : > { %v1667_v32 = vadd.f32 %v1656_v28, %v1628_v29  ;;  %v1630_v33 = vadd.f32 %v1629_v31, %v1528_v26  ;;  %v2662_v29 = vld [vmem:[%s3668_s4 + $0x28] sm:$0xff]  ;;  %v1704_v31 = vpop.permute.xlu0 %1703 }
 0x5cc   : > { %v1633_v34 = vpop.f32.mrf.mxu1 }
 0x5cd   : > { %v1668_v37 = vadd.f32 %v1656_v28, %v1630_v33  ;;  %v1634_v38 = vadd.f32 %v1633_v34, %v1532_v30  ;;  %v1675_v39 = vmul.f32 0.5, %v1667_v32  ;;  %v2661_v28 = vld [vmem:[%s3668_s4 + $0x20] sm:$0xff]  ;;  %v1709_v34 = vpop.permute.xlu1 %1708 }
 0x5ce   : > { %v1635_v48 = vpop.f32.mrf.mxu1 }
 0x5cf   : > { %v1676_v50 = vmul.f32 0.5, %v1668_v37  ;;  %v1669_v7 = vadd.f32 %v1661_v35, %v1634_v38  ;;  %v1636_v43 = vadd.f32 %v1635_v48, %v1534_v41 }
 0x5d1   : > { %2839 = vtanh.f32 %v1676_v50  ;;  %v1677_v46 = vmul.f32 0.5, %v1669_v7  ;;  %v1670_v47 = vadd.f32 %v1661_v35, %v1636_v43  ;;  %v2696_v43 = vld [vmem:[%s3667_s3 + $0x78] sm:$0xff] }
 0x5d2   : > { %2841 = vtanh.f32 %v1675_v39 }
 0x5d3   : > { %2843 = vtanh.f32 %v1677_v46  ;;  %v1678_v6 = vmul.f32 0.5, %v1670_v47  ;;  %v2668_v46 = vld [vmem:[%s3670_s6 + $0x28] sm:$0xff]  ;;  %v2695_v47 = vld [vmem:[%s3667_s3 + $0x70] sm:$0xff] }
 0x5d5   : > { %2845 = vtanh.f32 %v1678_v6  ;;  %v2683_v6 = vld [vmem:[%s3666_s2 + $0x70] sm:$0xff] }
 0x5d6   : > { %2847 = vtanh.f32 %v1666_v52  ;;  %v2684_v52 = vld [vmem:[%s3666_s2 + $0x78] sm:$0xff] }
 0x5d7   : > { %2849 = vtanh.f32 %v1665_v54  ;;  %v796_v54 = vld [vmem:[%s3671_s7 + $0x8] sm:$0xff] }
 0x5d8   : > { %2851 = vtanh.f32 %v1664_v55  ;;  %v2633_v55 = vld [vmem:[%s3671_s7 + $0x10] sm:$0xff] }
 0x5d9   : > { %2853 = vtanh.f32 %v1663_v56  ;;  %v2634_v56 = vld [vmem:[%s3671_s7 + $0x18] sm:$0xff] }
 0x5de   : > { %v2840_v57 = vpop.eup %2839 }
 0x5df   : > { %v2842_v58 = vpop.eup %2841  ;;  %v1684_v61 = vmul.f32 0.5, %v2840_v57  ;;  %v2669_v57 = vld [vmem:[%s3671_s7 + $0x20] sm:$0xff] }
 0x5e0   : > { %v2844_v59 = vpop.eup %2843  ;;  %v1683_v63 = vmul.f32 0.5, %v2842_v58  ;;  %v2670_v58 = vld [vmem:[%s3671_s7 + $0x28] sm:$0xff] }
 0x5e1   : > { %v1685_v60 = vmul.f32 0.5, %v2844_v59  ;;  %v1688_v12 = vadd.f32 0.5, %v1684_v61  ;;  %v2705_v59 = vld [vmem:[%s3671_s7 + $0x30] sm:$0xff] }
 0x5e2   : > { %v2846_v62 = vpop.eup %2845  ;;  %v1687_v16 = vadd.f32 0.5, %v1683_v63 }
 0x5e3   : > { %v1686_v0 = vmul.f32 0.5, %v2846_v62  ;;  %v1689_v8 = vadd.f32 0.5, %v1685_v60  ;;  %v2848_v14 = vpop.eup %2847  ;;  %v2706_v60 = vld [vmem:[%s3671_s7 + $0x38] sm:$0xff] }
 0x5e4   : > { %v2850_v18 = vpop.eup %2849 }
 0x5e5   : > { %v1690_v10 = vadd.f32 0.5, %v1686_v0  ;;  %v2852_v22 = vpop.eup %2851  ;;  %v1693_v24 = vmul.f32 %v2850_v18, %v1689_v8  ;;  %v2679_v18 = vld [vmem:[%s3679_s1 + $0x70] sm:$0xff] }
 0x5e6   : > { %v2854_v25 = vpop.eup %2853  ;;  %v1692_v26 = vmul.f32 %v2852_v22, %v1688_v12 }
 0x5e7   : > { %v1694_v20 = vmul.f32 %v2848_v14, %v1690_v10  ;;  %v1691_v27 = vmul.f32 %v2854_v25, %v1687_v16  ;;  %v2677_v16 = vld [vmem:[%s3679_s1 + $0x60] sm:$0xff] }
 0x5e9   : > { %1745 = vmatprep.subr.mxu0 %v1694_v20 }
 0x5ea   : > { %1746 = vmatpush1.msra.mxu0 %v1693_v24  ;;  %v2680_v24 = vld [vmem:[%s3679_s1 + $0x78] sm:$0xff] }
 0x5eb   : > { %1747 = vmatprep.subr.mxu0 %v1692_v26 }
 0x5ec   : > { %1748 = vmatpush1.msra.mxu0 %v1691_v27 }
 0x5ed   : > { %2665 = vmatmul.mubr.msk.f32.vlgmr.msra.gmra.mxu0 %vm437_vm1, %v2661_v28 }
 0x5ee   : > { %1787 = vmatprep.mubr.f32.mxu0 %v2954_v1 }
 0x5f1   : > { %2666 = vmatmul.mubr.msk.f32.gmra.mxu0 %vm437_vm1, %v2662_v29 }
 0x5f2   : > { %2014 = vmatprep.mubr.f32.mxu0 %v2954_v1 }
 0x6ad   : > { %v1783_v30 = vpop.f32.mrf.mxu0 }
 0x6ae   : > { %v1784_v41 = vadd.f32 %v1783_v30, %v1704_v31 }
 0x6af   : > { %v1785_v32 = vpop.f32.mrf.mxu0 }
 0x6b0   : > { %v1786_v33 = vadd.f32 %v1785_v32, %v1704_v31  ;;  %v3402_v1 = vadd.f32 %v1784_v41, %v3294_v44  ;;  %v2681_v44 = vld [vmem:[%s3666_s2 + $0x60] sm:$0xff] }
 0x6b1   : > { %v1789_v35 = vpop.f32.mrf.mxu0 }
 0x6b2   : > { %v3391_v37 = vadd.f32 %v1786_v33, %v3283_v36  ;;  %v1790_v38 = vadd.f32 %v1789_v35, %v1709_v34  ;;  %v3405_v36 = vld [vmem:[#allocation2] sm:$0xff] }
 0x6b3   : > { %v1791_v39 = vpop.f32.mrf.mxu0 }
 0x6b4   : > { %v3394_v48 = vadd.f32 %v1790_v38, %v3286_v40  ;;  %v1792_v50 = vadd.f32 %v1791_v39, %v1709_v34  ;;  %v1912_v45 = vsel %vm1910_vm7, %v3405_v36, %v3391_v37 }
 0x6b6   : > { %v3397_v7 = vadd.f32 %v1792_v50, %v3289_v42  ;;  %1844 = vmatprep.subr.mxu1 %v1792_v50  ;;  %1917 = vrot.lane.b32.xlu1 %v3394_v48, %s2959_s28  ;;  %v2667_v42 = vld [vmem:[%s3670_s6 + $0x20] sm:$0xff] }
 0x6b7   : > { %1845 = vmatpush1.msra.mxu1 %v1790_v38 }
 0x6b8   : > { %1846 = vmatprep.subr.mxu1 %v1786_v33  ;;  %1978 = vmatprep.subr.mxu0 %v3397_v7  ;;  %v1914_v40 = vsel %vm1910_vm7, %v3405_v36, %v3397_v7 }
 0x6b9   : > { %1921 = vrot.lane.b32.xlu0 %v1914_v40, %s2959_s28  ;;  %1847 = vmatpush1.msra.mxu1 %v1784_v41 }
 0x6ba   : > { %1979 = vmatpush1.msra.mxu0 %v3394_v48  ;;  %1915 = vrot.lane.b32.xlu1 %v3402_v1, %s2959_s28 }
 0x6bb   : > { %1980 = vmatprep.subr.mxu0 %v3391_v37  ;;  %2671 = vmatmul.mubr.msk.f32.vlgmr.msra.gmra.mxu1 %vm437_vm1, %v2667_v42 }
 0x6bc   : > { %1981 = vmatpush1.msra.mxu0 %v3402_v1  ;;  %1886 = vmatprep.mubr.f32.mxu1 %v3405_v36 }
 0x6bd   : > { %1919 = vrot.lane.b32.xlu0 %v1912_v45, %s2959_s28  ;;  %2685 = vmatmul.mubr.msk.f32.vlgmr.msra.gmra.mxu0 %vm437_vm1, %v2681_v44  ;;  %s3567_s28 = scalar_lea.vmem [#allocation5], %s2590_s15 }
 0x6be   : > { %2162 = vperm.xlu1 %2806, %v2696_v43   ;;  %2020 = vmatprep.mubr.f32.mxu0 %v3405_v36 }
 0x6bf   : > { %2672 = vmatmul.mubr.msk.f32.gmra.mxu1 %vm437_vm1, %v2668_v46 }
 0x6c0   : > { %2115 = vmatprep.mubr.f32.mxu1 %v3405_v36 }
 0x6c1   : > { %2157 = vperm.xlu0 %2805, %v2695_v47   ;;  %2686 = vmatmul.mubr.msk.f32.gmra.mxu0 %vm437_vm1, %v2682_v3 }
 0x6c2   : > { %2152 = vperm.xlu1 %2806, %v2694_v49   ;;  %2026 = vmatprep.mubr.f32.mxu0 %v3405_v36 }
 0x6c5   : > { %2147 = vperm.xlu0 %2805, %v2693_v4   ;;  %2687 = vmatmul.mubr.msk.f32.gmra.mxu0 %vm437_vm1, %v2683_v6 }
 0x6c6   : > { %2210 = vperm.xlu1 %2806, %v2700_v5   ;;  %2032 = vmatprep.mubr.f32.mxu0 %v3405_v36 }
 0x6c9   : > { %2205 = vperm.xlu0 %2805, %v2699_v51   ;;  %2688 = vmatmul.mubr.msk.f32.gmra.mxu0 %vm437_vm1, %v2684_v52 }
 0x6ca   : > { %799 = vperm.xlu1 %2806, %v795_v53   ;;  %2283 = vmatprep.mubr.f32.mxu0 %v3405_v36 }
 0x6cd   : > { %804 = vperm.xlu0 %2805, %v796_v54  }
 0x6ce   : > { %1300 = vperm.xlu1 %2806, %v2633_v55  }
 0x6d1   : > { %1305 = vperm.xlu0 %2805, %v2634_v56  }
 0x6d2   : > { %1802 = vperm.xlu1 %2806, %v2669_v57  }
 0x6d5   : > { %1807 = vperm.xlu0 %2805, %v2670_v58  }
 0x6d6   : > { %2304 = vperm.xlu1 %2806, %v2705_v59  }
 0x6d9   : > { %2309 = vperm.xlu0 %2805, %v2706_v60  }
 0x728   : > { %v1918_v61 = vpop.permute.xlu1 %1917 }
 0x72b   : > { %v1922_v62 = vpop.permute.xlu0 %1921 }
 0x72c   : > { %v1927_v63 = vsel %vm1923_vm8, %v1922_v62, %v1918_v61  ;;  %v1925_v0 = vsel %vm1923_vm8, %v1918_v61, %v1922_v62  ;;  %v1916_v8 = vpop.permute.xlu1 %1915 }
 0x72d   : > { %2079 = vmatprep.subr.mxu1 %v1925_v0 }
 0x72e   : > { %2080 = vmatpush1.msra.mxu1 %v1927_v63 }
 0x72f   : > { %v1920_v10 = vpop.permute.xlu0 %1919 }
 0x730   : > { %v1926_v12 = vsel %vm1923_vm8, %v1920_v10, %v1916_v8  ;;  %v1924_v14 = vsel %vm1923_vm8, %v1916_v8, %v1920_v10 }
 0x731   : > { %2081 = vmatprep.subr.mxu1 %v1924_v14 }
 0x732   : > { %2082 = vmatpush1.msra.mxu1 %v1926_v12 }
 0x733   : > { %2689 = vmatmul.mubr.msk.f32.vlgmr.msra.gmra.mxu1 %vm437_vm1, %v2677_v16 }
 0x734   : > { %2121 = vmatprep.mubr.f32.mxu1 %v3405_v36 }
 0x737   : > { %2690 = vmatmul.mubr.msk.f32.gmra.mxu1 %vm437_vm1, %v2678_v2 }
 0x738   : > { %2127 = vmatprep.mubr.f32.mxu1 %v3405_v36 }
 0x739   : > { %v3508_v20 = vpop.permute.xlu1 %2162 }
 0x73b   : > { %2691 = vmatmul.mubr.msk.f32.gmra.mxu1 %vm437_vm1, %v2679_v18 }
 0x73c   : > { %v2158_v22 = vpop.permute.xlu0 %2157  ;;  %2133 = vmatprep.mubr.f32.mxu1 %v3405_v36 }
 0x73d   : > { %v3515_v25 = vpop.permute.xlu1 %2152 }
 0x73f   : > { %2692 = vmatmul.mubr.msk.f32.gmra.mxu1 %vm437_vm1, %v2680_v24 }
 0x740   : > { %v3518_v26 = vpop.permute.xlu0 %2147  ;;  %2382 = vmatprep.mubr.f32.mxu1 %v3405_v36 }
 0x741   : > { %v3521_v27 = vpop.permute.xlu1 %2210 }
 0x744   : > { %v3524_v28 = vpop.permute.xlu0 %2205 }
 0x745   : > { %v800_v29 = vpop.permute.xlu1 %799 }
 0x746   : > { %v880_v30 = vadd.f32 %v3264_v17, %v800_v29  ;;  %v882_v31 = vadd.f32 %v3266_v19, %v800_v29 }
 0x748   : > { %890 = vst [vmem:[%s3528_s24] sm:$0xff] %v880_v30  ;;  %891 = vst [vmem:[%s3528_s24 + $0x8] sm:$0xff] %v882_v31  ;;  %v805_v32 = vpop.permute.xlu0 %804 }
 0x749   : > { %v886_v33 = vadd.f32 %v3268_v21, %v805_v32  ;;  %v888_v34 = vadd.f32 %v3270_v23, %v805_v32  ;;  %v1301_v17 = vpop.permute.xlu1 %1300 }
 0x74a   : > { %v1381_v19 = vadd.f32 %v3372_v9, %v1301_v17  ;;  %v1383_v35 = vadd.f32 %v3374_v11, %v1301_v17 }
 0x74b   : > { %892 = vst [vmem:[%s3528_s24 + $0x10] sm:$0xff] %v886_v33  ;;  %893 = vst [vmem:[%s3528_s24 + $0x18] sm:$0xff] %v888_v34 }
 0x74c   : > { %2637 = vst [vmem:[%s3528_s24 + $0x20] sm:$0xff] %v1381_v19  ;;  %2638 = vst [vmem:[%s3528_s24 + $0x28] sm:$0xff] %v1383_v35  ;;  %v1306_v38 = vpop.permute.xlu0 %1305 }
 0x74d   : > { %v1387_v39 = vadd.f32 %v3376_v13, %v1306_v38  ;;  %v1389_v41 = vadd.f32 %v3378_v15, %v1306_v38  ;;  %v1803_v21 = vpop.permute.xlu1 %1802 }
 0x74f   : > { %2639 = vst [vmem:[%s3528_s24 + $0x30] sm:$0xff] %v1387_v39  ;;  %2640 = vst [vmem:[%s3528_s24 + $0x38] sm:$0xff] %v1389_v41 }
 0x750   : > { %v1808_v40 = vpop.permute.xlu0 %1807 }
 0x77b   : > { %v1882_v23 = vpop.f32.mrf.mxu1 }
 0x77c   : > { %v1883_v50 = vadd.f32 %v1882_v23, %v1803_v21 }
 0x77d   : > { %v1884_v9 = vpop.f32.mrf.mxu1  ;;  %v2016_v13 = vpop.f32.mrf.mxu0 }
 0x77e   : > { %2673 = vst [vmem:[%s3528_s24 + $0x40] sm:$0xff] %v1883_v50  ;;  %v1885_v11 = vadd.f32 %v1884_v9, %v1803_v21 }
 0x77f   : > { %v1888_v42 = vpop.f32.mrf.mxu1  ;;  %v2018_v46 = vpop.f32.mrf.mxu0 }
 0x780   : > { %2674 = vst [vmem:[%s3528_s24 + $0x48] sm:$0xff] %v1885_v11  ;;  %v1889_v44 = vadd.f32 %v1888_v42, %v1808_v40 }
 0x781   : > { %v1890_v43 = vpop.f32.mrf.mxu1  ;;  %v2022_v15 = vpop.f32.mrf.mxu0 }
 0x782   : > { %2675 = vst [vmem:[%s3528_s24 + $0x50] sm:$0xff] %v1889_v44  ;;  %v1891_v45 = vadd.f32 %v1890_v43, %v1808_v40 }
 0x783   : > { %v2024_v47 = vpop.f32.mrf.mxu0 }
 0x784   : > { %2676 = vst [vmem:[%s3528_s24 + $0x58] sm:$0xff] %v1891_v45  ;;  %v2697_v45 = vld [vmem:[%s3668_s4 + $0x30] sm:$0xff] }
 0x785   : > { %v2028_v4 = vpop.f32.mrf.mxu0 }
 0x787   : > { %v2030_v51 = vpop.f32.mrf.mxu0 }
 0x789   : > { %v2034_v54 = vpop.f32.mrf.mxu0 }
 0x78b   : > { %v2036_v62 = vpop.f32.mrf.mxu0 }
 0x7f3   : > { %v2117_v3 = vpop.f32.mrf.mxu1 }
 0x7f4   : > { %v2118_v29 = vadd.f32 %v2117_v3, %v2016_v13  ;;  %v2698_v13 = vld [vmem:[%s3668_s4 + $0x38] sm:$0xff] }
 0x7f5   : > { %v2119_v49 = vpop.f32.mrf.mxu1 }
 0x7f6   : > { %v2120_v18 = vadd.f32 %v2119_v49, %v2018_v46  ;;  %v2165_v32 = vadd.f32 %v3518_v26, %v2118_v29 }
 0x7f7   : > { %v2123_v6 = vpop.f32.mrf.mxu1 }
 0x7f8   : > { %v2124_v2 = vadd.f32 %v2123_v6, %v2022_v15  ;;  %v2166_v31 = vadd.f32 %v3518_v26, %v2120_v18 }
 0x7f9   : > { %v2125_v5 = vpop.f32.mrf.mxu1 }
 0x7fa   : > { %v2126_v12 = vadd.f32 %v2125_v5, %v2024_v47  ;;  %v2167_v30 = vadd.f32 %v3515_v25, %v2124_v2 }
 0x7fb   : > { %v2129_v52 = vpop.f32.mrf.mxu1 }
 0x7fc   : > { %v2130_v53 = vadd.f32 %v2129_v52, %v2028_v4 }
 0x7fd   : > { %v2131_v55 = vpop.f32.mrf.mxu1 }
 0x7fe   : > { %v2169_v56 = vadd.f32 %v2158_v22, %v2130_v53  ;;  %v2132_v57 = vadd.f32 %v2131_v55, %v2030_v51  ;;  %v2703_v53 = vld [vmem:[%s3670_s6 + $0x30] sm:$0xff] }
 0x7ff   : > { %v2135_v58 = vpop.f32.mrf.mxu1 }
 0x800   : > { %v2170_v59 = vadd.f32 %v2158_v22, %v2132_v57  ;;  %v2136_v60 = vadd.f32 %v2135_v58, %v2034_v54  ;;  %v2177_v61 = vmul.f32 0.5, %v2169_v56  ;;  %v2168_v22 = vadd.f32 %v3515_v25, %v2126_v12  ;;  %v2310_v56 = vpop.permute.xlu0 %2309 }
 0x801   : > { %v2137_v63 = vpop.f32.mrf.mxu1 }
 0x802   : > { %v2178_v0 = vmul.f32 0.5, %v2170_v59  ;;  %v2171_v8 = vadd.f32 %v3508_v20, %v2136_v60  ;;  %v2138_v10 = vadd.f32 %v2137_v63, %v2036_v62 }
 0x804   : > { %2855 = vtanh.f32 %v2178_v0  ;;  %v2179_v14 = vmul.f32 0.5, %v2171_v8  ;;  %v2172_v16 = vadd.f32 %v3508_v20, %v2138_v10 }
 0x805   : > { %2857 = vtanh.f32 %v2177_v61 }
 0x806   : > { %2859 = vtanh.f32 %v2179_v14  ;;  %v2180_v24 = vmul.f32 0.5, %v2172_v16 }
 0x808   : > { %2861 = vtanh.f32 %v2180_v24 }
 0x809   : > { %2863 = vtanh.f32 %v2168_v22 }
 0x80a   : > { %2865 = vtanh.f32 %v2167_v30 }
 0x80b   : > { %2867 = vtanh.f32 %v2166_v31 }
 0x80c   : > { %2869 = vtanh.f32 %v2165_v32 }
 0x811   : > { %v2856_v20 = vpop.eup %2855 }
 0x812   : > { %v2858_v33 = vpop.eup %2857  ;;  %v2186_v19 = vmul.f32 0.5, %v2856_v20 }
 0x813   : > { %v2860_v34 = vpop.eup %2859  ;;  %v2185_v38 = vmul.f32 0.5, %v2858_v33 }
 0x814   : > { %v2187_v17 = vmul.f32 0.5, %v2860_v34  ;;  %v2190_v23 = vadd.f32 0.5, %v2186_v19 }
 0x815   : > { %v2862_v35 = vpop.eup %2861  ;;  %v2189_v50 = vadd.f32 0.5, %v2185_v38 }
 0x816   : > { %v2188_v39 = vmul.f32 0.5, %v2862_v35  ;;  %v2191_v41 = vadd.f32 0.5, %v2187_v17  ;;  %v2864_v25 = vpop.eup %2863 }
 0x817   : > { %v2866_v9 = vpop.eup %2865 }
 0x818   : > { %v2192_v21 = vadd.f32 0.5, %v2188_v39  ;;  %v2868_v11 = vpop.eup %2867  ;;  %v2195_v40 = vmul.f32 %v2866_v9, %v2191_v41 }
 0x819   : > { %v2870_v42 = vpop.eup %2869  ;;  %v2194_v44 = vmul.f32 %v2868_v11, %v2190_v23 }
 0x81a   : > { %v2196_v26 = vmul.f32 %v2864_v25, %v2192_v21  ;;  %v2193_v43 = vmul.f32 %v2870_v42, %v2189_v50 }
 0x81c   : > { %2247 = vmatprep.subr.mxu0 %v2196_v26 }
 0x81d   : > { %2248 = vmatpush1.msra.mxu0 %v2195_v40 }
 0x81e   : > { %2249 = vmatprep.subr.mxu0 %v2194_v44 }
 0x81f   : > { %2250 = vmatpush1.msra.mxu0 %v2193_v43 }
 0x820   : > { %2701 = vmatmul.mubr.msk.f32.vlgmr.msra.gmra.mxu0 %vm437_vm1, %v2697_v45 }
 0x821   : > { %2289 = vmatprep.mubr.f32.mxu0 %v3405_v36 }
 0x824   : > { %2702 = vmatmul.mubr.msk.f32.gmra.mxu0 %vm437_vm1, %v2698_v13 }
 0x8e0   : > { %v2285_v46 = vpop.f32.mrf.mxu0 }
 0x8e1   : > { %v2286_v15 = vadd.f32 %v2285_v46, %v3524_v28 }
 0x8e2   : > { %v2287_v47 = vpop.f32.mrf.mxu0 }
 0x8e3   : > { %v2400_v3 = vadd.f32 %v2286_v15, %v3402_v1  ;;  %v2288_v49 = vadd.f32 %v2287_v47, %v3524_v28 }
 0x8e4   : > { %v2291_v4 = vpop.f32.mrf.mxu0 }
 0x8e5   : > { %2404 = vst [vmem:[%s3567_s28] sm:$0xff] %v2400_v3  ;;  %v2401_v6 = vadd.f32 %v2288_v49, %v3391_v37  ;;  %v2292_v5 = vadd.f32 %v2291_v4, %v3521_v27  ;;  %v2704_v37 = vld [vmem:[%s3670_s6 + $0x38] sm:$0xff] }
 0x8e6   : > { %v2293_v51 = vpop.f32.mrf.mxu0 }
 0x8e7   : > { %2405 = vst [vmem:[%s3567_s28 + $0x8] sm:$0xff] %v2401_v6  ;;  %v2402_v52 = vadd.f32 %v2292_v5, %v3394_v48  ;;  %v2294_v1 = vadd.f32 %v2293_v51, %v3521_v27  ;;  %v2305_v48 = vpop.permute.xlu1 %2304 }
 0x8e9   : > { %2406 = vst [vmem:[%s3567_s28 + $0x10] sm:$0xff] %v2402_v52  ;;  %v2403_v28 = vadd.f32 %v2294_v1, %v3397_v7  ;;  %2346 = vmatprep.subr.mxu1 %v2294_v1 }
 0x8ea   : > { %2347 = vmatpush1.msra.mxu1 %v2292_v5 }
 0x8eb   : > { %2407 = vst [vmem:[%s3567_s28 + $0x18] sm:$0xff] %v2403_v28  ;;  %2348 = vmatprep.subr.mxu1 %v2288_v49 }
 0x8ec   : > { %2349 = vmatpush1.msra.mxu1 %v2286_v15 }
 0x8ed   : > { %2707 = vmatmul.mubr.msk.f32.vlgmr.msra.gmra.mxu1 %vm437_vm1, %v2703_v53 }
 0x8ee   : > { %2388 = vmatprep.mubr.f32.mxu1 %v3405_v36 }
 0x8f1   : > { %2708 = vmatmul.mubr.msk.f32.gmra.mxu1 %vm437_vm1, %v2704_v37 }
 0x9ad   : > { %v2384_v7 = vpop.f32.mrf.mxu1 }
 0x9ae   : > { %v2385_v27 = vadd.f32 %v2384_v7, %v2305_v48 }
 0x9af   : > { %v2386_v54 = vpop.f32.mrf.mxu1 }
 0x9b0   : > { %2709 = vst [vmem:[%s3528_s24 + $0x60] sm:$0xff] %v2385_v27  ;;  %v2387_v55 = vadd.f32 %v2386_v54, %v2305_v48 }
 0x9b1   : > { %v2390_v57 = vpop.f32.mrf.mxu1 }
 0x9b2   : > { %2710 = vst [vmem:[%s3528_s24 + $0x68] sm:$0xff] %v2387_v55  ;;  %v2391_v58 = vadd.f32 %v2390_v57, %v2310_v56 }
 0x9b3   : > { %v2392_v36 = vpop.f32.mrf.mxu1 }
 0x9b4   : > { %2711 = vst [vmem:[%s3528_s24 + $0x70] sm:$0xff] %v2391_v58  ;;  %v2393_v59 = vadd.f32 %v2392_v36, %v2310_v56 }
 0x9b6   : > { %2712 = vst [vmem:[%s3528_s24 + $0x78] sm:$0xff] %v2393_v59 }
 0x9b7   : > { %s2722_s29 = sshll.u32 %s2944_s12, 9  ;;  %s2439_s15 = sshll.u32 %s3528_s24, 4  ;;  %s2440_s15 = int_to_ptr.vmem [resolvable:$true] %s2439_s15 }
 0x9b8   : > { %s2428_s23 = scalar_lea.hbm %s3672_s8, %s2722_s29  ;;  %s2960_s25 = smov 512  }
 0x9b9   : > { %2724 = sst [smem:[#allocation8]] (%p3060_p4), %s2960_s25  ;;  %s2961_s27 = smov 1024  }
 0x9ba   : > { %2725 = sst [smem:[#allocation8 + $0x1]] (%p3060_p4), %s2961_s27  ;;  %s2962_s0 = smov 2  }
 0x9bb   : > { %2726 = sst [smem:[#allocation8 + $0x2]] (%p3060_p4), %s2962_s0  ;;  %s2963_s1 = smov 256  }
 0x9bc   : > { %2727 = sst [smem:[#allocation8 + $0x3]] (%p3060_p4), %s2963_s1  ;;  %s2964_s12 = smov 16  }
 0x9bd   : > { %2728 = sst [smem:[#allocation8 + $0x4]] (%p3060_p4), %s2963_s1  ;;  %s2965_s24 = smov 131072  }
 0x9be   : > { %2729 = sst [smem:[#allocation8 + $0x5]] (%p3060_p4), %s2964_s12  ;;  %s2966_s18 = smov 0  }
 0x9bf   : > { %2730 = dma.general (%p3060_p4), %s2440_s15, 2048, %s2428_s23, %s2409_s26, %s2965_s24, [#allocation8], %s2966_s18, 0  }
 0x9c0   : > { %s3615_s27 = scalar_lea.hbm %s3673_s9, %s2722_s29  ;;  %s2470_s0 = sshll.u32 %s3567_s28, 4  ;;  %s3618_s0 = int_to_ptr.vmem [resolvable:$true] %s2470_s0 }
 0x9c1   : > { %s2872_s1 = scalar_lea.vmem %s3618_s0, 512  ;;  %s2967_s12 = smov [#allocation5]  }
 0x9c2   : > { %p2873_p12 = scmp.ne.s32.totalorder %s3618_s0, %s2872_s1  ;;  %s2876_s26 = sshll.u32 %s2967_s12, 4  ;;  %s2877_s26 = int_to_ptr.vmem [resolvable:$false] %s2876_s26 }
 0x9c3   : > { %s2878_s15 = scalar_lea.vmem %s2877_s26, 1024  ;;  %p2879_p1 = scmp.lt.s32.totalorder %s3618_s0, %s2877_s26 }
 0x9c4   : > { %p2874_p13 = pnand %p2873_p12, %p3060_p4  ;;  %p2880_p2 = scmp.lt.s32.totalorder %s2878_s15, %s2872_s1 }
 0x9c6   : > { %p2875_p0 = pneg %p2874_p13  ;;  %p2881_p3 = por %p2880_p2, %p2879_p1 }
 0x9c8   : > { %p2882_p5 = pnand %p2881_p3, %p2875_p0 }
 0x9ca   : > { %2885 = shalt.err (!%p2882_p5)
}
 0x9cb   : > { %s2886_s28 = scalar_lea.hbm %s3615_s27, 512  ;;  %s2890_s24 = scalar_lea.hbm %s3673_s9, 1024 }
 0x9cc   : > { %p2887_p6 = scmp.ne.s32.totalorder %s3615_s27, %s2886_s28  ;;  %p2891_p10 = scmp.lt.s32.totalorder %s3615_s27, %s3673_s9 }
 0x9cd   : > { %p2892_p11 = scmp.lt.s32.totalorder %s2890_s24, %s2886_s28 }
 0x9ce   : > { %p2888_p7 = pnand %p2887_p6, %p3060_p4 }
 0x9cf   : > { %p2893_p12 = por %p2892_p11, %p2891_p10 }
 0x9d0   : > { %p2889_p9 = pneg %p2888_p7 }
 0x9d2   : > { %p2894_p13 = pnand %p2893_p12, %p2889_p9 }
 0x9d4   : > { %2897 = shalt.err (!%p2894_p13)
}
 0x9d5   : > { %s2968_s25 = smov 256   ;;  %s2969_s1 = smov 16  }
 0x9d6   : > { %s3680_s12 = scalar_lea.sflag [#allocation6], %s3469_s16 }
 0x9d7   : > { %2731 = dma.vmem_to_hbm [thread:$0]  (%p3060_p4), %s3618_s0, 512, %s3615_s27, %s3680_s12, %s2968_s25, %s2968_s25, %s2969_s1  }
 0x9d8 PF: > { %p2741_p0 = scmp.ge.s32.totalorder %s2952_s14, 2  ;;  %s2485_s26 = sand.u32 1, %s2932_s30  }
 0x9d9   : > { %s2486_s15 = scalar_lea.sflag [#allocation4], %s2485_s26 }
 0x9da   : > { %p2735_p1 = pnand %p2741_p0, %p3067_p8 }
 0x9dc   : > { %p2736_p2 = pneg %p2735_p1 }
 0x9de   : > { %2923 = dma.done.wait (%p2736_p2), %s2486_s15, 2048  }
 0x9df   : > { %2925 = vsyncadd (%p2736_p2), %s2486_s15, 4294965248  ;;  %s2495_s28 = scalar_lea.sflag [#allocation6], %s2485_s26 }
 0x9e0   : > { %2927 = dma.done.wait (%p2736_p2), %s2495_s28, 512  }
 0x9e1   : > { %2929 = vsyncadd (%p2736_p2), %s2495_s28, 4294966784  ;;  %s26_s14 = sadd.s32 1, %s2952_s14   ;;  %s3681_s30 = smov %s2936_s10 }
 0x9e2   : > { %p23_p3 = scmp.ge.s32.totalorder %s26_s14, 4   ;;  %s3682_s10 = smov %s2940_s11 }
 0x9e3   : > { %s3683_s11 = smov %s3073_s22  ;;  %s3684_s12 = smov %s2948_s13 }
 0x9e4   : > { %s3685_s13 = smov %s3687_s17  ;;  %25 = sbr.rel (!%p23_p3) target bundleno = 9 (0x9), region = 140 }
 0x9e9   :  { %2500 = vsyncpa [#allocation4], 1 }
 0x9ea   :  { %2502 = vsyncpa [#allocation4 + $0x1], 1 }
 0x9eb   :  { %2503 = vsyncpa [#allocation6], 1 }
 0x9ec   :  { %2505 = vsyncpa [#allocation6 + $0x1], 1 }

</bundles_post_ra>
